<compile_context>
chip_gen: v7x
topology: tpu7x:2x2x1
jax: 0.10.0
libtpu: 0.0.40
codegen_flags: <defaults>
</compile_context>

<pallas_src>
import jax
import jax.numpy as jnp
from jax import lax
from jax.experimental import pallas as pl
from jax.experimental.pallas import tpu as pltpu


def _round_up(x, m):
    return (x + m - 1) // m * m


# -----------------------------------------------------------------------------
# Pallas kernel: bidirectional vanilla RNN (tanh), single layer.
#   forward : h_t = tanh(x_t @ Wih_f + h_{t-1} @ Whh_f + b_f)
#   backward: g_t = tanh(x_{S-1-t} @ Wih_b + g_{t-1} @ Whh_b + b_b)
#   out[t]  = concat(h_t, g aligned at time t)   (forward lanes [:Hp],
#             backward lanes [Hp:])
# -----------------------------------------------------------------------------
def birnn_kernel(x_ref,        # [S, Bt, Hp]   time-major, padded
                 wih_ref,      # [Hp, 2*Hp]    [Wih_f | Wih_b]  (x @ W layout)
                 whh_f_ref,    # [Hp, Hp]
                 whh_b_ref,    # [Hp, Hp]
                 b_ref,        # [1, 2*Hp]     [b_f | b_b]  (b_ih + b_hh folded)
                 out_ref):     # [S, Bt, 2*Hp]
    S, Bt, Hp = x_ref.shape
    H2 = out_ref.shape[-1]                      # 2 * Hp

    # ---- Phase 1: bulk input projection (no carry dependence). --------------
    # One big matmul (M = S*Bt) instead of 2*S tiny per-step matmuls; bias is
    # folded in here so it is off the serial critical path.  Result is staged
    # directly in out_ref (same shape) -> no extra VMEM scratch.
    x_flat = x_ref[...].reshape(S * Bt, Hp)
    xw = jnp.dot(x_flat, wih_ref[...], preferred_element_type=jnp.float32)
    xw = xw + b_ref[...]
    out_ref[...] = xw.reshape(S, Bt, H2).astype(out_ref.dtype)

    # Hoist recurrent weights out of the loop (single VMEM load each).
    whh_f = whh_f_ref[...]
    whh_b = whh_b_ref[...]

    h0 = jnp.zeros((Bt, Hp), jnp.float32)

    # ---- Phase 2: serial recurrence: only h @ Whh + tanh. -------------------
    # Forward (index t) and backward (index S-1-t) chains are independent, so
    # their MXU pushes and EUP tanh ops interleave; unrolling gives the
    # scheduler visibility across iterations.
    def step(t, carry):
        h_f, h_b = carry
        tb = S - 1 - t

        pre_f = out_ref[t, :, :Hp]              # x_t  @ Wih_f + b_f (precomputed)
        pre_b = out_ref[tb, :, Hp:]             # x_tb @ Wih_b + b_b

        h_f = jnp.tanh(pre_f + jnp.dot(h_f, whh_f,
                                       preferred_element_type=jnp.float32))
        h_b = jnp.tanh(pre_b + jnp.dot(h_b, whh_b,
                                       preferred_element_type=jnp.float32))

        out_ref[t, :, :Hp] = h_f                # 128-aligned, unmasked stores
        out_ref[tb, :, Hp:] = h_b
        return h_f, h_b

    unroll = True if S <= 32 else 4
    lax.fori_loop(0, S, step, (h0, h0), unroll=unroll)


def birnn_pallas(x_tbh, params, *, b_tile=8):
    """x_tbh: [S, B, H] float32 time-major hidden states. Returns [B, S, 2H]."""
    S, B, H = x_tbh.shape
    f32 = jnp.float32

    Hp = _round_up(H, 128)                       # lane-align hidden size
    b_tile = max(8, _round_up(b_tile, 8))        # sublane-aligned batch tile
    Bp = _round_up(B, b_tile)

    # Pad activations to aligned shapes. Padded hidden lanes stay exactly zero
    # through the recurrence because the corresponding weight rows/cols are 0
    # and tanh(0) = 0.
    x_pad = jnp.zeros((S, Bp, Hp), f32).at[:, :B, :H].set(x_tbh.astype(f32))

    # Pack both directions' input projections so one matmul produces the
    # concatenated pre-activations; fold b_ih + b_hh in as well.
    wih = (jnp.zeros((Hp, 2 * Hp), f32)
           .at[:H, :H].set(params["wih_f"])
           .at[:H, Hp:Hp + H].set(params["wih_b"]))
    bias = (jnp.zeros((1, 2 * Hp), f32)
            .at[:, :H].set(params["b_f"])
            .at[:, Hp:Hp + H].set(params["b_b"]))
    whh_f = jnp.zeros((Hp, Hp), f32).at[:H, :H].set(params["whh_f"])
    whh_b = jnp.zeros((Hp, Hp), f32).at[:H, :H].set(params["whh_b"])

    grid = (Bp // b_tile,)
    out = pl.pallas_call(
        birnn_kernel,
        out_shape=jax.ShapeDtypeStruct((S, Bp, 2 * Hp), f32),
        grid=grid,
        in_specs=[
            pl.BlockSpec((S, b_tile, Hp), lambda b: (0, b, 0)),      # x (batch-tiled)
            pl.BlockSpec((Hp, 2 * Hp), lambda b: (0, 0)),            # Wih packed
            pl.BlockSpec((Hp, Hp), lambda b: (0, 0)),                # Whh fwd
            pl.BlockSpec((Hp, Hp), lambda b: (0, 0)),                # Whh bwd
            pl.BlockSpec((1, 2 * Hp), lambda b: (0, 0)),             # bias packed
        ],
        out_specs=pl.BlockSpec((S, b_tile, 2 * Hp), lambda b: (0, b, 0)),
        compiler_params=pltpu.CompilerParams(
            dimension_semantics=("parallel",),
            vmem_limit_bytes=64 << 20),
    )(x_pad, wih, whh_f, whh_b, bias)

    if H == Hp and B == Bp:
        return jnp.transpose(out, (1, 0, 2))                 # [B, S, 2H]
    # Strip padding (only hit for unaligned toy shapes).
    out_f = out[:, :B, :H]
    out_b = out[:, :B, Hp:Hp + H]
    return jnp.transpose(jnp.concatenate([out_f, out_b], axis=-1), (1, 0, 2))


# -----------------------------------------------------------------------------
# Synthetic "UtteranceRNN" forward:
#   hidden_states = base(input_ids, attention_mask)   (synthetic embedding)
#   outputs, _    = rnn(hidden_states)                 (Pallas kernel)
# -----------------------------------------------------------------------------
def utterance_rnn_forward(input_ids, attention_mask, params, seq_len=None):
    # seq_len is unused, matching the PyTorch forward.
    emb = params["embedding"][input_ids]                       # [B, S, H]
    hidden_states = emb * attention_mask[..., None].astype(emb.dtype)
    x_tbh = jnp.transpose(hidden_states, (1, 0, 2))            # [S, B, H]
    return birnn_pallas(x_tbh, params)                         # [B, S, 2H]


# -----------------------------------------------------------------------------
# Pure-JAX reference for the bidirectional RNN (matches torch.nn.RNN math).
# -----------------------------------------------------------------------------
def birnn_reference(x_tbh, params):
    S, B, H = x_tbh.shape

    def scan_dir(xs, wih, whh, b):
        def f(h, x_t):
            h = jnp.tanh(x_t @ wih + h @ whh + b)
            return h, h
        _, ys = lax.scan(f, jnp.zeros((B, H), jnp.float32), xs)
        return ys

    out_f = scan_dir(x_tbh, params["wih_f"], params["whh_f"], params["b_f"])
    out_b = scan_dir(x_tbh[::-1], params["wih_b"], params["whh_b"],
                     params["b_b"])[::-1]
    out = jnp.concatenate([out_f, out_b], axis=-1)
    return jnp.transpose(out, (1, 0, 2))


def init_params(key, vocab_size, hidden_size):
    ks = jax.random.split(key, 9)
    s = 1.0 / jnp.sqrt(hidden_size)

    def u(k, shape):
        return jax.random.uniform(k, shape, jnp.float32, -s, s)

    return {
        "embedding": jax.random.normal(ks[0], (vocab_size, hidden_size),
                                       jnp.float32) * 0.02,
        # Stored transposed relative to torch (torch: h = x @ W_ih^T + ...).
        "wih_f": u(ks[1], (hidden_size, hidden_size)),
        "whh_f": u(ks[2], (hidden_size, hidden_size)),
        "b_f":   u(ks[3], (1, hidden_size)) + u(ks[4], (1, hidden_size)),
        "wih_b": u(ks[5], (hidden_size, hidden_size)),
        "whh_b": u(ks[6], (hidden_size, hidden_size)),
        "b_b":   u(ks[7], (1, hidden_size)) + u(ks[8], (1, hidden_size)),
    }


if __name__ == "__main__":
    B, S, H, V = 2, 8, 32, 64

    key = jax.random.PRNGKey(0)
    k_ids, k_params = jax.random.split(key)

    input_ids = jax.random.randint(k_ids, (B, S), 0, V, dtype=jnp.int32)
    attention_mask = jnp.ones((B, S), dtype=jnp.int32).at[1, S - 2:].set(0)

    params = init_params(k_params, V, H)

    out = utterance_rnn_forward(input_ids, attention_mask, params)
    out = jax.block_until_ready(out)

    # Correctness check against pure-JAX reference.
    emb = params["embedding"][input_ids] * attention_mask[..., None].astype(jnp.float32)
    ref = birnn_reference(jnp.transpose(emb, (1, 0, 2)), params)
    ref = jax.block_until_ready(ref)

    assert out.shape == (B, S, 2 * H), out.shape
    assert jnp.allclose(out, ref, atol=1e-5, rtol=1e-5), "mismatch vs reference"

    print("KERNEL_OK")
</pallas_src>

<mosaic_0001>
module attributes {stable_mosaic.version = 11 : i64} {
  func.func @birnn_kernel(%arg0: i32, %arg1: memref<8x8x128xf32, #tpu.memory_space<vmem>>, %arg2: memref<128x256xf32, #tpu.memory_space<vmem>>, %arg3: memref<128x128xf32, #tpu.memory_space<vmem>>, %arg4: memref<128x128xf32, #tpu.memory_space<vmem>>, %arg5: memref<1x256xf32, #tpu.memory_space<vmem>>, %arg6: memref<8x8x256xf32, #tpu.memory_space<vmem>>) attributes {dimension_semantics = [#tpu.dimension_semantics<parallel>], iteration_bounds = array<i64: 1>, scalar_prefetch = 0 : i64, scratch_operands = 0 : i64, tpu.core_type = #tpu.core_type<tc>, window_params = [{transform_indices = @transform_0, window_bounds = array<i64: 8, 8, 128>}, {pipeline_mode = #tpu.pipeline_mode<synchronous>, transform_indices = @transform_1, window_bounds = array<i64: 128, 256>}, {pipeline_mode = #tpu.pipeline_mode<synchronous>, transform_indices = @transform_2, window_bounds = array<i64: 128, 128>}, {pipeline_mode = #tpu.pipeline_mode<synchronous>, transform_indices = @transform_3, window_bounds = array<i64: 128, 128>}, {pipeline_mode = #tpu.pipeline_mode<synchronous>, transform_indices = @transform_4, window_bounds = array<i64: 1, 256>}, {transform_indices = @transform_5, window_bounds = array<i64: 8, 8, 256>}]} {
    %c0 = arith.constant 0 : index
    %c0_0 = arith.constant 0 : index
    %c0_1 = arith.constant 0 : index
    %0 = vector.load %arg1[%c0, %c0_0, %c0_1] : memref<8x8x128xf32, #tpu.memory_space<vmem>>, vector<8x8x128xf32>
    %1 = vector.shape_cast %0 : vector<8x8x128xf32> to vector<64x128xf32>
    %c0_2 = arith.constant 0 : index
    %c0_3 = arith.constant 0 : index
    %2 = vector.load %arg2[%c0_2, %c0_3] : memref<128x256xf32, #tpu.memory_space<vmem>>, vector<128x256xf32>
    %cst = arith.constant dense<0.000000e+00> : vector<64x256xf32>
    %3 = tpu.matmul %1, %2, %cst {dimension_numbers = #tpu.dot_dimension_numbers<[1], [0], [0], [1], [0, 0, 1, 1], [], []>} : vector<64x128xf32>, vector<128x256xf32>, vector<64x256xf32> -> vector<64x256xf32>
    %c0_4 = arith.constant 0 : index
    %c0_5 = arith.constant 0 : index
    %4 = vector.load %arg5[%c0_4, %c0_5] : memref<1x256xf32, #tpu.memory_space<vmem>>, vector<1x256xf32>
    %5 = vector.broadcast %4 : vector<1x256xf32> to vector<64x256xf32>
    %6 = arith.addf %3, %5 : vector<64x256xf32>
    %7 = vector.shape_cast %6 : vector<64x256xf32> to vector<8x8x256xf32>
    %c0_6 = arith.constant 0 : index
    %c0_7 = arith.constant 0 : index
    %c0_8 = arith.constant 0 : index
    %8 = vector.load %arg6[%c0_6, %c0_7, %c0_8] : memref<8x8x256xf32, #tpu.memory_space<vmem>>, vector<8x8x256xf32>
    tpu.vector_store %arg6[%c0_6, %c0_7, %c0_8], %7 {strides = array<i32>} : memref<8x8x256xf32, #tpu.memory_space<vmem>>, vector<8x8x256xf32>,
    %c0_9 = arith.constant 0 : index
    %c0_10 = arith.constant 0 : index
    %9 = vector.load %arg3[%c0_9, %c0_10] : memref<128x128xf32, #tpu.memory_space<vmem>>, vector<128x128xf32>
    %c0_11 = arith.constant 0 : index
    %c0_12 = arith.constant 0 : index
    %10 = vector.load %arg4[%c0_11, %c0_12] : memref<128x128xf32, #tpu.memory_space<vmem>>, vector<128x128xf32>
    %cst_13 = arith.constant 0.000000e+00 : f32
    %11 = vector.broadcast %cst_13 : f32 to vector<8x128xf32>
    %c0_i32 = arith.constant 0 : i32
    %c7_i32 = arith.constant 7 : i32
    %12 = arith.subi %c7_i32, %c0_i32 : i32
    %13 = arith.index_cast %c0_i32 : i32 to index
    %c0_14 = arith.constant 0 : index
    %c0_15 = arith.constant 0 : index
    %14 = vector.load %arg6[%13, %c0_14, %c0_15] : memref<8x8x256xf32, #tpu.memory_space<vmem>>, vector<1x8x128xf32>
    %15 = vector.shape_cast %14 : vector<1x8x128xf32> to vector<8x128xf32>
    %16 = arith.index_cast %12 : i32 to index
    %c0_16 = arith.constant 0 : index
    %c128 = arith.constant 128 : index
    %17 = vector.load %arg6[%16, %c0_16, %c128] : memref<8x8x256xf32, #tpu.memory_space<vmem>>, vector<1x8x128xf32>
    %18 = vector.shape_cast %17 : vector<1x8x128xf32> to vector<8x128xf32>
    %cst_17 = arith.constant dense<0.000000e+00> : vector<8x128xf32>
    %19 = tpu.matmul %11, %9, %cst_17 {dimension_numbers = #tpu.dot_dimension_numbers<[1], [0], [0], [1], [0, 0, 1, 1], [], []>} : vector<8x128xf32>, vector<128x128xf32>, vector<8x128xf32> -> vector<8x128xf32>
    %20 = arith.addf %15, %19 : vector<8x128xf32>
    %21 = math.tanh %20 : vector<8x128xf32>
    %cst_18 = arith.constant dense<0.000000e+00> : vector<8x128xf32>
    %22 = tpu.matmul %11, %10, %cst_18 {dimension_numbers = #tpu.dot_dimension_numbers<[1], [0], [0], [1], [0, 0, 1, 1], [], []>} : vector<8x128xf32>, vector<128x128xf32>, vector<8x128xf32> -> vector<8x128xf32>
    %23 = arith.addf %18, %22 : vector<8x128xf32>
    %24 = math.tanh %23 : vector<8x128xf32>
    %25 = arith.index_cast %c0_i32 : i32 to index
    %c0_19 = arith.constant 0 : index
    %c0_20 = arith.constant 0 : index
    %26 = vector.load %arg6[%25, %c0_19, %c0_20] : memref<8x8x256xf32, #tpu.memory_space<vmem>>, vector<1x8x128xf32>
    %27 = vector.shape_cast %26 : vector<1x8x128xf32> to vector<8x128xf32>
    %28 = vector.shape_cast %21 : vector<8x128xf32> to vector<1x8x128xf32>
    tpu.vector_store %arg6[%25, %c0_19, %c0_20], %28 {strides = array<i32>} : memref<8x8x256xf32, #tpu.memory_space<vmem>>, vector<1x8x128xf32>,
    %29 = arith.index_cast %12 : i32 to index
    %c0_21 = arith.constant 0 : index
    %c128_22 = arith.constant 128 : index
    %30 = vector.load %arg6[%29, %c0_21, %c128_22] : memref<8x8x256xf32, #tpu.memory_space<vmem>>, vector<1x8x128xf32>
    %31 = vector.shape_cast %30 : vector<1x8x128xf32> to vector<8x128xf32>
    %32 = vector.shape_cast %24 : vector<8x128xf32> to vector<1x8x128xf32>
    tpu.vector_store %arg6[%29, %c0_21, %c128_22], %32 {strides = array<i32>} : memref<8x8x256xf32, #tpu.memory_space<vmem>>, vector<1x8x128xf32>,
    %c1_i32 = arith.constant 1 : i32
    %c7_i32_23 = arith.constant 7 : i32
    %33 = arith.subi %c7_i32_23, %c1_i32 : i32
    %34 = arith.index_cast %c1_i32 : i32 to index
    %c0_24 = arith.constant 0 : index
    %c0_25 = arith.constant 0 : index
    %35 = vector.load %arg6[%34, %c0_24, %c0_25] : memref<8x8x256xf32, #tpu.memory_space<vmem>>, vector<1x8x128xf32>
    %36 = vector.shape_cast %35 : vector<1x8x128xf32> to vector<8x128xf32>
    %37 = arith.index_cast %33 : i32 to index
    %c0_26 = arith.constant 0 : index
    %c128_27 = arith.constant 128 : index
    %38 = vector.load %arg6[%37, %c0_26, %c128_27] : memref<8x8x256xf32, #tpu.memory_space<vmem>>, vector<1x8x128xf32>
    %39 = vector.shape_cast %38 : vector<1x8x128xf32> to vector<8x128xf32>
    %cst_28 = arith.constant dense<0.000000e+00> : vector<8x128xf32>
    %40 = tpu.matmul %21, %9, %cst_28 {dimension_numbers = #tpu.dot_dimension_numbers<[1], [0], [0], [1], [0, 0, 1, 1], [], []>} : vector<8x128xf32>, vector<128x128xf32>, vector<8x128xf32> -> vector<8x128xf32>
    %41 = arith.addf %36, %40 : vector<8x128xf32>
    %42 = math.tanh %41 : vector<8x128xf32>
    %cst_29 = arith.constant dense<0.000000e+00> : vector<8x128xf32>
    %43 = tpu.matmul %24, %10, %cst_29 {dimension_numbers = #tpu.dot_dimension_numbers<[1], [0], [0], [1], [0, 0, 1, 1], [], []>} : vector<8x128xf32>, vector<128x128xf32>, vector<8x128xf32> -> vector<8x128xf32>
    %44 = arith.addf %39, %43 : vector<8x128xf32>
    %45 = math.tanh %44 : vector<8x128xf32>
    %46 = arith.index_cast %c1_i32 : i32 to index
    %c0_30 = arith.constant 0 : index
    %c0_31 = arith.constant 0 : index
    %47 = vector.load %arg6[%46, %c0_30, %c0_31] : memref<8x8x256xf32, #tpu.memory_space<vmem>>, vector<1x8x128xf32>
    %48 = vector.shape_cast %47 : vector<1x8x128xf32> to vector<8x128xf32>
    %49 = vector.shape_cast %42 : vector<8x128xf32> to vector<1x8x128xf32>
    tpu.vector_store %arg6[%46, %c0_30, %c0_31], %49 {strides = array<i32>} : memref<8x8x256xf32, #tpu.memory_space<vmem>>, vector<1x8x128xf32>,
    %50 = arith.index_cast %33 : i32 to index
    %c0_32 = arith.constant 0 : index
    %c128_33 = arith.constant 128 : index
    %51 = vector.load %arg6[%50, %c0_32, %c128_33] : memref<8x8x256xf32, #tpu.memory_space<vmem>>, vector<1x8x128xf32>
    %52 = vector.shape_cast %51 : vector<1x8x128xf32> to vector<8x128xf32>
    %53 = vector.shape_cast %45 : vector<8x128xf32> to vector<1x8x128xf32>
    tpu.vector_store %arg6[%50, %c0_32, %c128_33], %53 {strides = array<i32>} : memref<8x8x256xf32, #tpu.memory_space<vmem>>, vector<1x8x128xf32>,
    %c2_i32 = arith.constant 2 : i32
    %c7_i32_34 = arith.constant 7 : i32
    %54 = arith.subi %c7_i32_34, %c2_i32 : i32
    %55 = arith.index_cast %c2_i32 : i32 to index
    %c0_35 = arith.constant 0 : index
    %c0_36 = arith.constant 0 : index
    %56 = vector.load %arg6[%55, %c0_35, %c0_36] : memref<8x8x256xf32, #tpu.memory_space<vmem>>, vector<1x8x128xf32>
    %57 = vector.shape_cast %56 : vector<1x8x128xf32> to vector<8x128xf32>
    %58 = arith.index_cast %54 : i32 to index
    %c0_37 = arith.constant 0 : index
    %c128_38 = arith.constant 128 : index
    %59 = vector.load %arg6[%58, %c0_37, %c128_38] : memref<8x8x256xf32, #tpu.memory_space<vmem>>, vector<1x8x128xf32>
    %60 = vector.shape_cast %59 : vector<1x8x128xf32> to vector<8x128xf32>
    %cst_39 = arith.constant dense<0.000000e+00> : vector<8x128xf32>
    %61 = tpu.matmul %42, %9, %cst_39 {dimension_numbers = #tpu.dot_dimension_numbers<[1], [0], [0], [1], [0, 0, 1, 1], [], []>} : vector<8x128xf32>, vector<128x128xf32>, vector<8x128xf32> -> vector<8x128xf32>
    %62 = arith.addf %57, %61 : vector<8x128xf32>
    %63 = math.tanh %62 : vector<8x128xf32>
    %cst_40 = arith.constant dense<0.000000e+00> : vector<8x128xf32>
    %64 = tpu.matmul %45, %10, %cst_40 {dimension_numbers = #tpu.dot_dimension_numbers<[1], [0], [0], [1], [0, 0, 1, 1], [], []>} : vector<8x128xf32>, vector<128x128xf32>, vector<8x128xf32> -> vector<8x128xf32>
    %65 = arith.addf %60, %64 : vector<8x128xf32>
    %66 = math.tanh %65 : vector<8x128xf32>
    %67 = arith.index_cast %c2_i32 : i32 to index
    %c0_41 = arith.constant 0 : index
    %c0_42 = arith.constant 0 : index
    %68 = vector.load %arg6[%67, %c0_41, %c0_42] : memref<8x8x256xf32, #tpu.memory_space<vmem>>, vector<1x8x128xf32>
    %69 = vector.shape_cast %68 : vector<1x8x128xf32> to vector<8x128xf32>
    %70 = vector.shape_cast %63 : vector<8x128xf32> to vector<1x8x128xf32>
    tpu.vector_store %arg6[%67, %c0_41, %c0_42], %70 {strides = array<i32>} : memref<8x8x256xf32, #tpu.memory_space<vmem>>, vector<1x8x128xf32>,
    %71 = arith.index_cast %54 : i32 to index
    %c0_43 = arith.constant 0 : index
    %c128_44 = arith.constant 128 : index
    %72 = vector.load %arg6[%71, %c0_43, %c128_44] : memref<8x8x256xf32, #tpu.memory_space<vmem>>, vector<1x8x128xf32>
    %73 = vector.shape_cast %72 : vector<1x8x128xf32> to vector<8x128xf32>
    %74 = vector.shape_cast %66 : vector<8x128xf32> to vector<1x8x128xf32>
    tpu.vector_store %arg6[%71, %c0_43, %c128_44], %74 {strides = array<i32>} : memref<8x8x256xf32, #tpu.memory_space<vmem>>, vector<1x8x128xf32>,
    %c3_i32 = arith.constant 3 : i32
    %c7_i32_45 = arith.constant 7 : i32
    %75 = arith.subi %c7_i32_45, %c3_i32 : i32
    %76 = arith.index_cast %c3_i32 : i32 to index
    %c0_46 = arith.constant 0 : index
    %c0_47 = arith.constant 0 : index
    %77 = vector.load %arg6[%76, %c0_46, %c0_47] : memref<8x8x256xf32, #tpu.memory_space<vmem>>, vector<1x8x128xf32>
    %78 = vector.shape_cast %77 : vector<1x8x128xf32> to vector<8x128xf32>
    %79 = arith.index_cast %75 : i32 to index
    %c0_48 = arith.constant 0 : index
    %c128_49 = arith.constant 128 : index
    %80 = vector.load %arg6[%79, %c0_48, %c128_49] : memref<8x8x256xf32, #tpu.memory_space<vmem>>, vector<1x8x128xf32>
    %81 = vector.shape_cast %80 : vector<1x8x128xf32> to vector<8x128xf32>
    %cst_50 = arith.constant dense<0.000000e+00> : vector<8x128xf32>
    %82 = tpu.matmul %63, %9, %cst_50 {dimension_numbers = #tpu.dot_dimension_numbers<[1], [0], [0], [1], [0, 0, 1, 1], [], []>} : vector<8x128xf32>, vector<128x128xf32>, vector<8x128xf32> -> vector<8x128xf32>
    %83 = arith.addf %78, %82 : vector<8x128xf32>
    %84 = math.tanh %83 : vector<8x128xf32>
    %cst_51 = arith.constant dense<0.000000e+00> : vector<8x128xf32>
    %85 = tpu.matmul %66, %10, %cst_51 {dimension_numbers = #tpu.dot_dimension_numbers<[1], [0], [0], [1], [0, 0, 1, 1], [], []>} : vector<8x128xf32>, vector<128x128xf32>, vector<8x128xf32> -> vector<8x128xf32>
    %86 = arith.addf %81, %85 : vector<8x128xf32>
    %87 = math.tanh %86 : vector<8x128xf32>
    %88 = arith.index_cast %c3_i32 : i32 to index
    %c0_52 = arith.constant 0 : index
    %c0_53 = arith.constant 0 : index
    %89 = vector.load %arg6[%88, %c0_52, %c0_53] : memref<8x8x256xf32, #tpu.memory_space<vmem>>, vector<1x8x128xf32>
    %90 = vector.shape_cast %89 : vector<1x8x128xf32> to vector<8x128xf32>
    %91 = vector.shape_cast %84 : vector<8x128xf32> to vector<1x8x128xf32>
    tpu.vector_store %arg6[%88, %c0_52, %c0_53], %91 {strides = array<i32>} : memref<8x8x256xf32, #tpu.memory_space<vmem>>, vector<1x8x128xf32>,
    %92 = arith.index_cast %75 : i32 to index
    %c0_54 = arith.constant 0 : index
    %c128_55 = arith.constant 128 : index
    %93 = vector.load %arg6[%92, %c0_54, %c128_55] : memref<8x8x256xf32, #tpu.memory_space<vmem>>, vector<1x8x128xf32>
    %94 = vector.shape_cast %93 : vector<1x8x128xf32> to vector<8x128xf32>
    %95 = vector.shape_cast %87 : vector<8x128xf32> to vector<1x8x128xf32>
    tpu.vector_store %arg6[%92, %c0_54, %c128_55], %95 {strides = array<i32>} : memref<8x8x256xf32, #tpu.memory_space<vmem>>, vector<1x8x128xf32>,
    %c4_i32 = arith.constant 4 : i32
    %c7_i32_56 = arith.constant 7 : i32
    %96 = arith.subi %c7_i32_56, %c4_i32 : i32
    %97 = arith.index_cast %c4_i32 : i32 to index
    %c0_57 = arith.constant 0 : index
    %c0_58 = arith.constant 0 : index
    %98 = vector.load %arg6[%97, %c0_57, %c0_58] : memref<8x8x256xf32, #tpu.memory_space<vmem>>, vector<1x8x128xf32>
    %99 = vector.shape_cast %98 : vector<1x8x128xf32> to vector<8x128xf32>
    %100 = arith.index_cast %96 : i32 to index
    %c0_59 = arith.constant 0 : index
    %c128_60 = arith.constant 128 : index
    %101 = vector.load %arg6[%100, %c0_59, %c128_60] : memref<8x8x256xf32, #tpu.memory_space<vmem>>, vector<1x8x128xf32>
    %102 = vector.shape_cast %101 : vector<1x8x128xf32> to vector<8x128xf32>
    %cst_61 = arith.constant dense<0.000000e+00> : vector<8x128xf32>
    %103 = tpu.matmul %84, %9, %cst_61 {dimension_numbers = #tpu.dot_dimension_numbers<[1], [0], [0], [1], [0, 0, 1, 1], [], []>} : vector<8x128xf32>, vector<128x128xf32>, vector<8x128xf32> -> vector<8x128xf32>
    %104 = arith.addf %99, %103 : vector<8x128xf32>
    %105 = math.tanh %104 : vector<8x128xf32>
    %cst_62 = arith.constant dense<0.000000e+00> : vector<8x128xf32>
    %106 = tpu.matmul %87, %10, %cst_62 {dimension_numbers = #tpu.dot_dimension_numbers<[1], [0], [0], [1], [0, 0, 1, 1], [], []>} : vector<8x128xf32>, vector<128x128xf32>, vector<8x128xf32> -> vector<8x128xf32>
    %107 = arith.addf %102, %106 : vector<8x128xf32>
    %108 = math.tanh %107 : vector<8x128xf32>
    %109 = arith.index_cast %c4_i32 : i32 to index
    %c0_63 = arith.constant 0 : index
    %c0_64 = arith.constant 0 : index
    %110 = vector.load %arg6[%109, %c0_63, %c0_64] : memref<8x8x256xf32, #tpu.memory_space<vmem>>, vector<1x8x128xf32>
    %111 = vector.shape_cast %110 : vector<1x8x128xf32> to vector<8x128xf32>
    %112 = vector.shape_cast %105 : vector<8x128xf32> to vector<1x8x128xf32>
    tpu.vector_store %arg6[%109, %c0_63, %c0_64], %112 {strides = array<i32>} : memref<8x8x256xf32, #tpu.memory_space<vmem>>, vector<1x8x128xf32>,
    %113 = arith.index_cast %96 : i32 to index
    %c0_65 = arith.constant 0 : index
    %c128_66 = arith.constant 128 : index
    %114 = vector.load %arg6[%113, %c0_65, %c128_66] : memref<8x8x256xf32, #tpu.memory_space<vmem>>, vector<1x8x128xf32>
    %115 = vector.shape_cast %114 : vector<1x8x128xf32> to vector<8x128xf32>
    %116 = vector.shape_cast %108 : vector<8x128xf32> to vector<1x8x128xf32>
    tpu.vector_store %arg6[%113, %c0_65, %c128_66], %116 {strides = array<i32>} : memref<8x8x256xf32, #tpu.memory_space<vmem>>, vector<1x8x128xf32>,
    %c5_i32 = arith.constant 5 : i32
    %c7_i32_67 = arith.constant 7 : i32
    %117 = arith.subi %c7_i32_67, %c5_i32 : i32
    %118 = arith.index_cast %c5_i32 : i32 to index
    %c0_68 = arith.constant 0 : index
    %c0_69 = arith.constant 0 : index
    %119 = vector.load %arg6[%118, %c0_68, %c0_69] : memref<8x8x256xf32, #tpu.memory_space<vmem>>, vector<1x8x128xf32>
    %120 = vector.shape_cast %119 : vector<1x8x128xf32> to vector<8x128xf32>
    %121 = arith.index_cast %117 : i32 to index
    %c0_70 = arith.constant 0 : index
    %c128_71 = arith.constant 128 : index
    %122 = vector.load %arg6[%121, %c0_70, %c128_71] : memref<8x8x256xf32, #tpu.memory_space<vmem>>, vector<1x8x128xf32>
    %123 = vector.shape_cast %122 : vector<1x8x128xf32> to vector<8x128xf32>
    %cst_72 = arith.constant dense<0.000000e+00> : vector<8x128xf32>
    %124 = tpu.matmul %105, %9, %cst_72 {dimension_numbers = #tpu.dot_dimension_numbers<[1], [0], [0], [1], [0, 0, 1, 1], [], []>} : vector<8x128xf32>, vector<128x128xf32>, vector<8x128xf32> -> vector<8x128xf32>
    %125 = arith.addf %120, %124 : vector<8x128xf32>
    %126 = math.tanh %125 : vector<8x128xf32>
    %cst_73 = arith.constant dense<0.000000e+00> : vector<8x128xf32>
    %127 = tpu.matmul %108, %10, %cst_73 {dimension_numbers = #tpu.dot_dimension_numbers<[1], [0], [0], [1], [0, 0, 1, 1], [], []>} : vector<8x128xf32>, vector<128x128xf32>, vector<8x128xf32> -> vector<8x128xf32>
    %128 = arith.addf %123, %127 : vector<8x128xf32>
    %129 = math.tanh %128 : vector<8x128xf32>
    %130 = arith.index_cast %c5_i32 : i32 to index
    %c0_74 = arith.constant 0 : index
    %c0_75 = arith.constant 0 : index
    %131 = vector.load %arg6[%130, %c0_74, %c0_75] : memref<8x8x256xf32, #tpu.memory_space<vmem>>, vector<1x8x128xf32>
    %132 = vector.shape_cast %131 : vector<1x8x128xf32> to vector<8x128xf32>
    %133 = vector.shape_cast %126 : vector<8x128xf32> to vector<1x8x128xf32>
    tpu.vector_store %arg6[%130, %c0_74, %c0_75], %133 {strides = array<i32>} : memref<8x8x256xf32, #tpu.memory_space<vmem>>, vector<1x8x128xf32>,
    %134 = arith.index_cast %117 : i32 to index
    %c0_76 = arith.constant 0 : index
    %c128_77 = arith.constant 128 : index
    %135 = vector.load %arg6[%134, %c0_76, %c128_77] : memref<8x8x256xf32, #tpu.memory_space<vmem>>, vector<1x8x128xf32>
    %136 = vector.shape_cast %135 : vector<1x8x128xf32> to vector<8x128xf32>
    %137 = vector.shape_cast %129 : vector<8x128xf32> to vector<1x8x128xf32>
    tpu.vector_store %arg6[%134, %c0_76, %c128_77], %137 {strides = array<i32>} : memref<8x8x256xf32, #tpu.memory_space<vmem>>, vector<1x8x128xf32>,
    %c6_i32 = arith.constant 6 : i32
    %c7_i32_78 = arith.constant 7 : i32
    %138 = arith.subi %c7_i32_78, %c6_i32 : i32
    %139 = arith.index_cast %c6_i32 : i32 to index
    %c0_79 = arith.constant 0 : index
    %c0_80 = arith.constant 0 : index
    %140 = vector.load %arg6[%139, %c0_79, %c0_80] : memref<8x8x256xf32, #tpu.memory_space<vmem>>, vector<1x8x128xf32>
    %141 = vector.shape_cast %140 : vector<1x8x128xf32> to vector<8x128xf32>
    %142 = arith.index_cast %138 : i32 to index
    %c0_81 = arith.constant 0 : index
    %c128_82 = arith.constant 128 : index
    %143 = vector.load %arg6[%142, %c0_81, %c128_82] : memref<8x8x256xf32, #tpu.memory_space<vmem>>, vector<1x8x128xf32>
    %144 = vector.shape_cast %143 : vector<1x8x128xf32> to vector<8x128xf32>
    %cst_83 = arith.constant dense<0.000000e+00> : vector<8x128xf32>
    %145 = tpu.matmul %126, %9, %cst_83 {dimension_numbers = #tpu.dot_dimension_numbers<[1], [0], [0], [1], [0, 0, 1, 1], [], []>} : vector<8x128xf32>, vector<128x128xf32>, vector<8x128xf32> -> vector<8x128xf32>
    %146 = arith.addf %141, %145 : vector<8x128xf32>
    %147 = math.tanh %146 : vector<8x128xf32>
    %cst_84 = arith.constant dense<0.000000e+00> : vector<8x128xf32>
    %148 = tpu.matmul %129, %10, %cst_84 {dimension_numbers = #tpu.dot_dimension_numbers<[1], [0], [0], [1], [0, 0, 1, 1], [], []>} : vector<8x128xf32>, vector<128x128xf32>, vector<8x128xf32> -> vector<8x128xf32>
    %149 = arith.addf %144, %148 : vector<8x128xf32>
    %150 = math.tanh %149 : vector<8x128xf32>
    %151 = arith.index_cast %c6_i32 : i32 to index
    %c0_85 = arith.constant 0 : index
    %c0_86 = arith.constant 0 : index
    %152 = vector.load %arg6[%151, %c0_85, %c0_86] : memref<8x8x256xf32, #tpu.memory_space<vmem>>, vector<1x8x128xf32>
    %153 = vector.shape_cast %152 : vector<1x8x128xf32> to vector<8x128xf32>
    %154 = vector.shape_cast %147 : vector<8x128xf32> to vector<1x8x128xf32>
    tpu.vector_store %arg6[%151, %c0_85, %c0_86], %154 {strides = array<i32>} : memref<8x8x256xf32, #tpu.memory_space<vmem>>, vector<1x8x128xf32>,
    %155 = arith.index_cast %138 : i32 to index
    %c0_87 = arith.constant 0 : index
    %c128_88 = arith.constant 128 : index
    %156 = vector.load %arg6[%155, %c0_87, %c128_88] : memref<8x8x256xf32, #tpu.memory_space<vmem>>, vector<1x8x128xf32>
    %157 = vector.shape_cast %156 : vector<1x8x128xf32> to vector<8x128xf32>
    %158 = vector.shape_cast %150 : vector<8x128xf32> to vector<1x8x128xf32>
    tpu.vector_store %arg6[%155, %c0_87, %c128_88], %158 {strides = array<i32>} : memref<8x8x256xf32, #tpu.memory_space<vmem>>, vector<1x8x128xf32>,
    %c7_i32_89 = arith.constant 7 : i32
    %c7_i32_90 = arith.constant 7 : i32
    %159 = arith.subi %c7_i32_90, %c7_i32_89 : i32
    %160 = arith.index_cast %c7_i32_89 : i32 to index
    %c0_91 = arith.constant 0 : index
    %c0_92 = arith.constant 0 : index
    %161 = vector.load %arg6[%160, %c0_91, %c0_92] : memref<8x8x256xf32, #tpu.memory_space<vmem>>, vector<1x8x128xf32>
    %162 = vector.shape_cast %161 : vector<1x8x128xf32> to vector<8x128xf32>
    %163 = arith.index_cast %159 : i32 to index
    %c0_93 = arith.constant 0 : index
    %c128_94 = arith.constant 128 : index
    %164 = vector.load %arg6[%163, %c0_93, %c128_94] : memref<8x8x256xf32, #tpu.memory_space<vmem>>, vector<1x8x128xf32>
    %165 = vector.shape_cast %164 : vector<1x8x128xf32> to vector<8x128xf32>
    %cst_95 = arith.constant dense<0.000000e+00> : vector<8x128xf32>
    %166 = tpu.matmul %147, %9, %cst_95 {dimension_numbers = #tpu.dot_dimension_numbers<[1], [0], [0], [1], [0, 0, 1, 1], [], []>} : vector<8x128xf32>, vector<128x128xf32>, vector<8x128xf32> -> vector<8x128xf32>
    %167 = arith.addf %162, %166 : vector<8x128xf32>
    %168 = math.tanh %167 : vector<8x128xf32>
    %cst_96 = arith.constant dense<0.000000e+00> : vector<8x128xf32>
    %169 = tpu.matmul %150, %10, %cst_96 {dimension_numbers = #tpu.dot_dimension_numbers<[1], [0], [0], [1], [0, 0, 1, 1], [], []>} : vector<8x128xf32>, vector<128x128xf32>, vector<8x128xf32> -> vector<8x128xf32>
    %170 = arith.addf %165, %169 : vector<8x128xf32>
    %171 = math.tanh %170 : vector<8x128xf32>
    %172 = arith.index_cast %c7_i32_89 : i32 to index
    %c0_97 = arith.constant 0 : index
    %c0_98 = arith.constant 0 : index
    %173 = vector.load %arg6[%172, %c0_97, %c0_98] : memref<8x8x256xf32, #tpu.memory_space<vmem>>, vector<1x8x128xf32>
    %174 = vector.shape_cast %173 : vector<1x8x128xf32> to vector<8x128xf32>
    %175 = vector.shape_cast %168 : vector<8x128xf32> to vector<1x8x128xf32>
    tpu.vector_store %arg6[%172, %c0_97, %c0_98], %175 {strides = array<i32>} : memref<8x8x256xf32, #tpu.memory_space<vmem>>, vector<1x8x128xf32>,
    %176 = arith.index_cast %159 : i32 to index
    %c0_99 = arith.constant 0 : index
    %c128_100 = arith.constant 128 : index
    %177 = vector.load %arg6[%176, %c0_99, %c128_100] : memref<8x8x256xf32, #tpu.memory_space<vmem>>, vector<1x8x128xf32>
    %178 = vector.shape_cast %177 : vector<1x8x128xf32> to vector<8x128xf32>
    %179 = vector.shape_cast %171 : vector<8x128xf32> to vector<1x8x128xf32>
    tpu.vector_store %arg6[%176, %c0_99, %c128_100], %179 {strides = array<i32>} : memref<8x8x256xf32, #tpu.memory_space<vmem>>, vector<1x8x128xf32>,
    %c8_i32 = arith.constant 8 : i32
    return
  }
  func.func @transform_0(%arg0: i32) -> (i32, i32, i32) {
    %c0_i32 = arith.constant 0 : i32
    %c0_i32_0 = arith.constant 0 : i32
    %c0_i32_1 = arith.constant 0 : i32
    return %c0_i32, %arg0, %c0_i32_0 : i32, i32, i32
  }
  func.func @transform_1(%arg0: i32) -> (i32, i32) {
    %c0_i32 = arith.constant 0 : i32
    %c0_i32_0 = arith.constant 0 : i32
    %c0_i32_1 = arith.constant 0 : i32
    return %c0_i32, %c0_i32_0 : i32, i32
  }
  func.func @transform_2(%arg0: i32) -> (i32, i32) {
    %c0_i32 = arith.constant 0 : i32
    %c0_i32_0 = arith.constant 0 : i32
    %c0_i32_1 = arith.constant 0 : i32
    return %c0_i32, %c0_i32_0 : i32, i32
  }
  func.func @transform_3(%arg0: i32) -> (i32, i32) {
    %c0_i32 = arith.constant 0 : i32
    %c0_i32_0 = arith.constant 0 : i32
    %c0_i32_1 = arith.constant 0 : i32
    return %c0_i32, %c0_i32_0 : i32, i32
  }
  func.func @transform_4(%arg0: i32) -> (i32, i32) {
    %c0_i32 = arith.constant 0 : i32
    %c0_i32_0 = arith.constant 0 : i32
    %c0_i32_1 = arith.constant 0 : i32
    return %c0_i32, %c0_i32_0 : i32, i32
  }
  func.func @transform_5(%arg0: i32) -> (i32, i32, i32) {
    %c0_i32 = arith.constant 0 : i32
    %c0_i32_0 = arith.constant 0 : i32
    %c0_i32_1 = arith.constant 0 : i32
    return %c0_i32, %arg0, %c0_i32_0 : i32, i32, i32
  }
}

</mosaic_0001>

<bundles_post_ra>
// kernel: tpu_custom_call.1
= control target key start
LH: loop header
LB: loop body
LE: loop exit
PB: predicated region body
PF: predicated region fallthrough
CT: control target
= control target key end

     0   :  { %10 = vsyncpa [#allocation3], 0  ;;  %s3442_s0 = inlined_call_operand.hbm [shape: f32[8,8,128], index: 0, kind: input, shape index: {}]   ;;  %s3443_s1 = inlined_call_operand.hbm [shape: f32[128,256], index: 1, kind: input, shape index: {}]   ;;  %s3444_s2 = inlined_call_operand.hbm [shape: f32[128,128], index: 2, kind: input, shape index: {}]   ;;  %s3445_s3 = inlined_call_operand.hbm [shape: f32[128,128], index: 3, kind: input, shape index: {}]   ;;  %s3446_s4 = inlined_call_operand.hbm [shape: f32[1,256], index: 4, kind: input, shape index: {}]   ;;  %s3447_s5 = inlined_call_operand.hbm [shape: f32[8,8,256], index: 5, kind: output, shape index: {}]  }
   0x1   :  { %11 = vsyncpa [#allocation6], 0 }
   0x2   :  { %12 = vsyncpa [#allocation9], 0 }
   0x3   :  { %13 = vsyncpa [#allocation4], 0  ;;  %s2943_s18 = smov [#allocation5]   ;;  %s2803_s22 = scalar_lea.hbm %s3443_s1, 4096 }
   0x4   :  { %s31_s19 = sshll.u32 %s2943_s18, 4  ;;  %p2804_p0 = scmp.ne.s32.totalorder %s3443_s1, %s2803_s22  ;;  %s32_s19 = int_to_ptr.vmem [resolvable:$true] %s31_s19 }
   0x5   :  { %p2807_p1 = scmp.lt.u32.totalorder %s2803_s22, %s3443_s1 }
   0x7   :  { %p2809_p2 = pnand %p2807_p1, %p2804_p0 }
   0x9   :  { %2812 = shalt.err (!%p2809_p2)
}
   0xa   :  { %s2813_s27 = scalar_lea.vmem %s32_s19, 4096  ;;  %p2818_p4 = scmp.lt.s32.totalorder %s32_s19, %s32_s19 }
   0xb   :  { %p2814_p3 = scmp.ne.s32.totalorder %s32_s19, %s2813_s27  ;;  %p2819_p5 = scmp.lt.s32.totalorder %s2813_s27, %s2813_s27 }
   0xd   :  { %p2820_p6 = por %p2819_p5, %p2818_p4 }
   0xf   :  { %p2821_p7 = pnand %p2820_p6, %p2814_p3 }
  0x11   :  { %2824 = shalt.err (!%p2821_p7)
}
  0x12   :  { %s2944_s28 = smov 256   ;;  %s2945_s29 = smov 16  }
  0x13   :  { %37 = dma.hbm_to_vmem [thread:$0]  %s3443_s1, 4096, %s32_s19, [#allocation6], %s2944_s28, %s2944_s28, %s2945_s29  }
  0x14   :  { %s2946_s7 = smov [#allocation8]   ;;  %s2947_s9 = smov [#allocation2]  }
  0x15   :  { %s55_s8 = sshll.u32 %s2946_s7, 4  ;;  %s19_s10 = sshll.u32 %s2947_s9, 4  ;;  %s56_s8 = int_to_ptr.vmem [resolvable:$true] %s55_s8  ;;  %s20_s10 = int_to_ptr.vmem [resolvable:$true] %s19_s10 }
  0x16   :  { %s2825_s13 = scalar_lea.hbm %s3445_s3, 2048 }
  0x17   :  { %p2826_p8 = scmp.ne.s32.totalorder %s3445_s3, %s2825_s13  ;;  %p2829_p9 = scmp.lt.u32.totalorder %s2825_s13, %s3445_s3 }
  0x19   :  { %p2831_p10 = pnand %p2829_p9, %p2826_p8 }
  0x1b   :  { %2834 = shalt.err (!%p2831_p10)
}
  0x1c   :  { %s2835_s1 = scalar_lea.vmem %s56_s8, 2048  ;;  %p2840_p12 = scmp.lt.s32.totalorder %s56_s8, %s56_s8 }
  0x1d   :  { %p2836_p11 = scmp.ne.s32.totalorder %s56_s8, %s2835_s1  ;;  %p2841_p13 = scmp.lt.s32.totalorder %s2835_s1, %s2835_s1 }
  0x1f   :  { %p2842_p0 = por %p2841_p13, %p2840_p12 }
  0x21   :  { %p2843_p1 = pnand %p2842_p0, %p2836_p11 }
  0x23   :  { %2846 = shalt.err (!%p2843_p1)
}
  0x24   :  { %s2948_s18 = smov 128   ;;  %s2949_s19 = smov 8  }
  0x25   :  { %61 = dma.hbm_to_vmem [thread:$0]  %s3445_s3, 2048, %s56_s8, [#allocation9], %s2948_s18, %s2948_s18, %s2949_s19  }
  0x26   :  { %s2847_s24 = scalar_lea.hbm %s3442_s0, 1024 }
  0x27   :  { %p2848_p2 = scmp.ne.s32.totalorder %s3442_s0, %s2847_s24  ;;  %p2851_p3 = scmp.lt.u32.totalorder %s2847_s24, %s3442_s0 }
  0x29   :  { %p2853_p4 = pnand %p2851_p3, %p2848_p2 }
  0x2b   :  { %2856 = shalt.err (!%p2853_p4)
}
  0x2c   :  { %s2857_s6 = scalar_lea.vmem %s20_s10, 1024  ;;  %p2862_p6 = scmp.lt.s32.totalorder %s20_s10, %s20_s10 }
  0x2d   :  { %p2858_p5 = scmp.ne.s32.totalorder %s20_s10, %s2857_s6  ;;  %p2863_p7 = scmp.lt.s32.totalorder %s2857_s6, %s2857_s6 }
  0x2f   :  { %p2864_p8 = por %p2863_p7, %p2862_p6 }
  0x31   :  { %p2865_p9 = pnand %p2864_p8, %p2858_p5 }
  0x33   :  { %2868 = shalt.err (!%p2865_p9)
}
  0x34   :  { %25 = dma.hbm_to_vmem [thread:$0]  %s3442_s0, 1024, %s20_s10, [#allocation3], %s2948_s18, %s2948_s18, %s2949_s19  }
  0x35   :  { %s2950_s8 = smov [#allocation7]   ;;  %s2951_s11 = smov [#allocation10]  }
  0x36   :  { %s43_s9 = sshll.u32 %s2950_s8, 4  ;;  %s68_s12 = sshll.u32 %s2951_s11, 4  ;;  %s44_s9 = int_to_ptr.vmem [resolvable:$true] %s43_s9  ;;  %s69_s12 = int_to_ptr.vmem [resolvable:$true] %s68_s12 }
  0x37   :  { %s2869_s15 = scalar_lea.hbm %s3444_s2, 2048 }
  0x38   :  { %p2870_p10 = scmp.ne.s32.totalorder %s3444_s2, %s2869_s15  ;;  %p2873_p11 = scmp.lt.u32.totalorder %s2869_s15, %s3444_s2 }
  0x3a   :  { %p2875_p12 = pnand %p2873_p11, %p2870_p10 }
  0x3c   :  { %2878 = shalt.err (!%p2875_p12)
}
  0x3d   :  { %s2879_s0 = scalar_lea.vmem %s44_s9, 2048  ;;  %p2884_p0 = scmp.lt.s32.totalorder %s44_s9, %s44_s9 }
  0x3e   :  { %p2880_p13 = scmp.ne.s32.totalorder %s44_s9, %s2879_s0  ;;  %p2885_p1 = scmp.lt.s32.totalorder %s2879_s0, %s2879_s0 }
  0x40   :  { %p2886_p2 = por %p2885_p1, %p2884_p0 }
  0x42   :  { %p2887_p3 = pnand %p2886_p2, %p2880_p13 }
  0x44   :  { %2890 = shalt.err (!%p2887_p3)
}
  0x45   :  { %49 = dma.hbm_to_vmem [thread:$0]  %s3444_s2, 2048, %s44_s9, [#allocation6], %s2948_s18, %s2948_s18, %s2949_s19  }
  0x46   :  { %s2891_s24 = scalar_lea.hbm %s3446_s4, 32 }
  0x47   :  { %p2892_p4 = scmp.ne.s32.totalorder %s3446_s4, %s2891_s24  ;;  %p2895_p5 = scmp.lt.u32.totalorder %s2891_s24, %s3446_s4 }
  0x49   :  { %p2897_p6 = pnand %p2895_p5, %p2892_p4 }
  0x4b   :  { %2900 = shalt.err (!%p2897_p6)
}
  0x4c   :  { %s2901_s6 = scalar_lea.vmem %s69_s12, 32  ;;  %p2906_p8 = scmp.lt.s32.totalorder %s69_s12, %s69_s12 }
  0x4d   :  { %p2902_p7 = scmp.ne.s32.totalorder %s69_s12, %s2901_s6  ;;  %p2907_p9 = scmp.lt.s32.totalorder %s2901_s6, %s2901_s6 }
  0x4f   :  { %p2908_p10 = por %p2907_p9, %p2906_p8 }
  0x51   :  { %p2909_p11 = pnand %p2908_p10, %p2902_p7 }
  0x53   :  { %2912 = shalt.err (!%p2909_p11)
}
  0x54   :  { %71 = dma.hbm_to_vmem [thread:$0]  %s3446_s4, 32, %s69_s12, [#allocation9]  }
  0x55   :  { %2935 = dma.done.wait [#allocation3], 1024  }
  0x56   :  { %2936 = vsyncadd [#allocation3], 4294966272 }
  0x57   :  { %2937 = dma.done.wait [#allocation6], 6144  }
  0x58   :  { %2938 = vsyncadd [#allocation6], 4294961152 }
  0x59   :  { %2939 = dma.done.wait [#allocation9], 2080  }
  0x5a   :  { %2940 = vsyncadd [#allocation9], 4294965216  ;;  %v2952_v0 = vmov 0.0|0.0   ;;  %v2953_v1 = vmov 0.0   ;;  %vm2954_vm0 = vmmov 0   ;;  %v96_v2 = vld [vmem:[#allocation5 + $0x8] sm:$0xff] }
  0x5b   :  { %2374 = vmatprep.subr.bf16.mxu1 %v2952_v0  ;;  %203 = vmatprep.mubr.f32.mxu0 %v2953_v1  ;;  %v98_v3 = vld [vmem:[#allocation5 + $0x18] sm:$0xff]  ;;  %v95_v4 = vld [vmem:[#allocation5] sm:$0xff]  ;;  %v97_v6 = vld [vmem:[#allocation5 + $0x10] sm:$0xff]  ;;  %s2955_s4 = smov [#allocation11]  }
  0x5c   :  { %1814 = vmatprep.mubr.msk.f32.mxu1 %vm2954_vm0, %v2953_v1  ;;  %v2342_v5 = vpack.c.bf16 %v98_v3, %v96_v2  ;;  %v100_v7 = vld [vmem:[#allocation5 + $0x28] sm:$0xff]  ;;  %v102_v8 = vld [vmem:[#allocation5 + $0x38] sm:$0xff]  ;;  %v2344_v9 = vpack.c.bf16 %v97_v6, %v95_v4  ;;  %v99_v11 = vld [vmem:[#allocation5 + $0x20] sm:$0xff]  ;;  %s1496_s19 = sshll.u32 %s2955_s4, 4  ;;  %s1497_s19 = int_to_ptr.vmem [resolvable:$true] %s1496_s19 }
  0x5d   :  { %v2346_v10 = vpack.c.bf16 %v102_v8, %v100_v7  ;;  %v101_v12 = vld [vmem:[#allocation5 + $0x30] sm:$0xff]  ;;  %v104_v13 = vld [vmem:[#allocation5 + $0x48] sm:$0xff]  ;;  %v106_v14 = vld [vmem:[#allocation5 + $0x58] sm:$0xff]  ;;  %s2913_s3 = scalar_lea.vmem %s1497_s19, 2048  ;;  %p2918_p13 = scmp.lt.s32.totalorder %s1497_s19, %s1497_s19 }
  0x5e   :  { %2343 = vmatprep.subr.bf16.mxu0 %v2342_v5  ;;  %v2348_v15 = vpack.c.bf16 %v101_v12, %v99_v11  ;;  %v268_v16 = vld [vmem:[#allocation7] sm:$0xff]  ;;  %v269_v17 = vld [vmem:[#allocation7 + $0x8] sm:$0xff]  ;;  %v2350_v18 = vpack.c.bf16 %v106_v14, %v104_v13  ;;  %v105_v20 = vld [vmem:[#allocation5 + $0x50] sm:$0xff]  ;;  %p2914_p12 = scmp.ne.s32.totalorder %s1497_s19, %s2913_s3  ;;  %p2919_p0 = scmp.lt.s32.totalorder %s2913_s3, %s2913_s3 }
  0x5f   :  { %2345 = vmatpush1.bf16.msra.mxu0 %v2344_v9  ;;  %v103_v19 = vld [vmem:[#allocation5 + $0x40] sm:$0xff]  ;;  %v3062_v21 = vpack.c.bf16 %v269_v17, %v268_v16  ;;  %v108_v22 = vld [vmem:[#allocation5 + $0x68] sm:$0xff]  ;;  %v110_v23 = vld [vmem:[#allocation5 + $0x78] sm:$0xff] }
  0x60   :  { %2347 = vmatprep.subr.bf16.mxu0 %v2346_v10  ;;  %v270_v24 = vld [vmem:[#allocation7 + $0x10] sm:$0xff]  ;;  %v271_v25 = vld [vmem:[#allocation7 + $0x18] sm:$0xff]  ;;  %v2352_v27 = vpack.c.bf16 %v105_v20, %v103_v19  ;;  %v272_v28 = vld [vmem:[#allocation7 + $0x20] sm:$0xff]  ;;  %v2354_v30 = vpack.c.bf16 %v110_v23, %v108_v22  ;;  %p2920_p1 = por %p2919_p0, %p2918_p13 }
  0x61   :  { %2376 = vmatpush3.bf16.msra.mxu1 %v3062_v21  ;;  %v3065_v26 = vpack.c.bf16 %v271_v25, %v270_v24  ;;  %v273_v29 = vld [vmem:[#allocation7 + $0x28] sm:$0xff]  ;;  %v107_v31 = vld [vmem:[#allocation5 + $0x60] sm:$0xff]  ;;  %v109_v32 = vld [vmem:[#allocation5 + $0x70] sm:$0xff] }
  0x62   :  { %2377 = vmatprep.subr.bf16.mxu1 %v2952_v0  ;;  %v112_v33 = vld [vmem:[#allocation5 + $0x88] sm:$0xff]  ;;  %v114_v34 = vld [vmem:[#allocation5 + $0x98] sm:$0xff]  ;;  %v3069_v35 = vpack.c.bf16 %v273_v29, %v272_v28  ;;  %v2356_v36 = vpack.c.bf16 %v109_v32, %v107_v31  ;;  %v274_v37 = vld [vmem:[#allocation7 + $0x30] sm:$0xff]  ;;  %p2921_p2 = pnand %p2920_p1, %p2914_p12 }
  0x63   :  { %2349 = vmatpush1.bf16.msra.mxu0 %v2348_v15  ;;  %v275_v38 = vld [vmem:[#allocation7 + $0x38] sm:$0xff]  ;;  %v2358_v39 = vpack.c.bf16 %v114_v34, %v112_v33  ;;  %v111_v40 = vld [vmem:[#allocation5 + $0x80] sm:$0xff]  ;;  %v113_v41 = vld [vmem:[#allocation5 + $0x90] sm:$0xff] }
  0x64   :  { %2351 = vmatprep.subr.bf16.mxu0 %v2350_v18  ;;  %v116_v42 = vld [vmem:[#allocation5 + $0xa8] sm:$0xff]  ;;  %v118_v43 = vld [vmem:[#allocation5 + $0xb8] sm:$0xff]  ;;  %v3073_v44 = vpack.c.bf16 %v275_v38, %v274_v37  ;;  %v2360_v45 = vpack.c.bf16 %v113_v41, %v111_v40  ;;  %v276_v46 = vld [vmem:[#allocation7 + $0x40] sm:$0xff] }
  0x65   :  { %2379 = vmatpush3.bf16.msra.mxu1 %v3065_v26  ;;  %v277_v47 = vld [vmem:[#allocation7 + $0x48] sm:$0xff]  ;;  %v2362_v48 = vpack.c.bf16 %v118_v43, %v116_v42  ;;  %v115_v49 = vld [vmem:[#allocation5 + $0xa0] sm:$0xff]  ;;  %v117_v50 = vld [vmem:[#allocation5 + $0xb0] sm:$0xff] }
  0x66   :  { %2380 = vmatprep.subr.bf16.mxu1 %v2952_v0  ;;  %v120_v51 = vld [vmem:[#allocation5 + $0xc8] sm:$0xff]  ;;  %v122_v52 = vld [vmem:[#allocation5 + $0xd8] sm:$0xff]  ;;  %v3077_v53 = vpack.c.bf16 %v277_v47, %v276_v46  ;;  %v2364_v54 = vpack.c.bf16 %v117_v50, %v115_v49  ;;  %v278_v55 = vld [vmem:[#allocation7 + $0x50] sm:$0xff] }
  0x67   :  { %2353 = vmatpush1.bf16.msra.mxu0 %v2352_v27  ;;  %v279_v56 = vld [vmem:[#allocation7 + $0x58] sm:$0xff]  ;;  %v2366_v57 = vpack.c.bf16 %v122_v52, %v120_v51  ;;  %v119_v58 = vld [vmem:[#allocation5 + $0xc0] sm:$0xff]  ;;  %v121_v59 = vld [vmem:[#allocation5 + $0xd0] sm:$0xff] }
  0x68   :  { %2355 = vmatprep.subr.bf16.mxu0 %v2354_v30  ;;  %v124_v60 = vld [vmem:[#allocation5 + $0xe8] sm:$0xff]  ;;  %v126_v61 = vld [vmem:[#allocation5 + $0xf8] sm:$0xff]  ;;  %v3081_v62 = vpack.c.bf16 %v279_v56, %v278_v55  ;;  %v2368_v63 = vpack.c.bf16 %v121_v59, %v119_v58  ;;  %v280_v2 = vld [vmem:[#allocation7 + $0x60] sm:$0xff] }
  0x69   :  { %2382 = vmatpush3.bf16.msra.mxu1 %v3069_v35  ;;  %v281_v3 = vld [vmem:[#allocation7 + $0x68] sm:$0xff]  ;;  %v2370_v4 = vpack.c.bf16 %v126_v61, %v124_v60  ;;  %v123_v5 = vld [vmem:[#allocation5 + $0xe0] sm:$0xff]  ;;  %v125_v6 = vld [vmem:[#allocation5 + $0xf0] sm:$0xff] }
  0x6a   :  { %2383 = vmatprep.subr.bf16.mxu1 %v2952_v0  ;;  %v3085_v7 = vpack.c.bf16 %v281_v3, %v280_v2  ;;  %v2372_v8 = vpack.c.bf16 %v125_v6, %v123_v5  ;;  %v282_v9 = vld [vmem:[#allocation7 + $0x70] sm:$0xff]  ;;  %v283_v10 = vld [vmem:[#allocation7 + $0x78] sm:$0xff]  ;;  %v284_v11 = vld [vmem:[#allocation8] sm:$0xff] }
  0x6b   :  { %2357 = vmatpush1.bf16.msra.mxu0 %v2356_v36  ;;  %v285_v12 = vld [vmem:[#allocation8 + $0x8] sm:$0xff]  ;;  %v3089_v13 = vpack.c.bf16 %v283_v10, %v282_v9  ;;  %v87_v14 = vld [vmem:[#allocation2] sm:$0xff]  ;;  %v286_v16 = vld [vmem:[#allocation8 + $0x10] sm:$0xff] }
  0x6c   :  { %2359 = vmatprep.subr.bf16.mxu0 %v2358_v39  ;;  %v3092_v15 = vpack.c.bf16 %v285_v12, %v284_v11  ;;  %v287_v17 = vld [vmem:[#allocation8 + $0x18] sm:$0xff]  ;;  %v88_v18 = vld [vmem:[#allocation2 + $0x8] sm:$0xff]  ;;  %v288_v20 = vld [vmem:[#allocation8 + $0x20] sm:$0xff] }
  0x6d   :  { %2385 = vmatpush3.bf16.msra.mxu1 %v3073_v44  ;;  %v3098_v19 = vpack.c.bf16 %v287_v17, %v286_v16  ;;  %v289_v22 = vld [vmem:[#allocation8 + $0x28] sm:$0xff]  ;;  %v89_v23 = vld [vmem:[#allocation2 + $0x10] sm:$0xff]  ;;  %v291_v27 = vld [vmem:[#allocation8 + $0x38] sm:$0xff] }
  0x6e   :  { %2386 = vmatprep.subr.bf16.mxu1 %v2952_v0  ;;  %v3106_v24 = vpack.c.bf16 %v289_v22, %v288_v20  ;;  %v290_v25 = vld [vmem:[#allocation8 + $0x30] sm:$0xff]  ;;  %v90_v28 = vld [vmem:[#allocation2 + $0x18] sm:$0xff]  ;;  %v292_v30 = vld [vmem:[#allocation8 + $0x40] sm:$0xff] }
  0x6f   :  { %2361 = vmatpush1.bf16.msra.mxu0 %v2360_v45  ;;  %v3115_v29 = vpack.c.bf16 %v291_v27, %v290_v25  ;;  %v293_v31 = vld [vmem:[#allocation8 + $0x48] sm:$0xff]  ;;  %v91_v32 = vld [vmem:[#allocation2 + $0x20] sm:$0xff]  ;;  %v294_v34 = vld [vmem:[#allocation8 + $0x50] sm:$0xff] }
  0x70   :  { %2363 = vmatprep.subr.bf16.mxu0 %v2362_v48  ;;  %v3122_v33 = vpack.c.bf16 %v293_v31, %v292_v30  ;;  %v295_v36 = vld [vmem:[#allocation8 + $0x58] sm:$0xff]  ;;  %v92_v37 = vld [vmem:[#allocation2 + $0x28] sm:$0xff]  ;;  %v296_v39 = vld [vmem:[#allocation8 + $0x60] sm:$0xff]  ;;  %v129_v48 = vlaneseq }
  0x71   :  { %2388 = vmatpush3.bf16.msra.mxu1 %v3077_v53  ;;  %v3129_v38 = vpack.c.bf16 %v295_v36, %v294_v34  ;;  %v297_v40 = vld [vmem:[#allocation8 + $0x68] sm:$0xff]  ;;  %v93_v41 = vld [vmem:[#allocation2 + $0x30] sm:$0xff]  ;;  %v299_v45 = vld [vmem:[#allocation8 + $0x78] sm:$0xff] }
  0x72   :  { %2389 = vmatprep.subr.bf16.mxu1 %v2952_v0  ;;  %v3136_v42 = vpack.c.bf16 %v297_v40, %v296_v39  ;;  %v298_v43 = vld [vmem:[#allocation8 + $0x70] sm:$0xff]  ;;  %v94_v46 = vld [vmem:[#allocation2 + $0x38] sm:$0xff]  ;;  %v130_v49 = vshrl.u32 %v129_v48, 7  ;;  %v127_v51 = vld [vmem:[#allocation10] sm:$0x3] }
  0x73   :  { %2365 = vmatpush1.bf16.msra.mxu0 %v2364_v54  ;;  %v3143_v47 = vpack.c.bf16 %v299_v45, %v298_v43 }
  0x74   :  { %2367 = vmatprep.subr.bf16.mxu0 %v2366_v57  ;;  %v131_v50 = vsub.s32 0, %v130_v49  ;;  %v135_v52 = vsub.s32 1, %v130_v49 }
  0x75   :  { %2391 = vmatpush3.bf16.msra.mxu1 %v3081_v62 }
  0x76   :  { %2392 = vmatprep.subr.bf16.mxu1 %v2952_v0  ;;  %v132_v54 = vrot.slane %v127_v51, %v131_v50  ;;  %v136_v55 = vrot.slane %v127_v51, %v135_v52 }
  0x77   :  { %2369 = vmatpush1.bf16.msra.mxu0 %v2368_v63 }
  0x78   :  { %2371 = vmatprep.subr.bf16.mxu0 %v2370_v4 }
  0x79   :  { %2394 = vmatpush3.bf16.msra.mxu1 %v3085_v7 }
  0x7a   :  { %2395 = vmatprep.subr.bf16.mxu1 %v2952_v0 }
  0x7b   :  { %2373 = vmatpush1.bf16.msra.mxu0 %v2372_v8 }
  0x7c   :  { %2398 = vmatprep.subr.bf16.mxu0 %v2952_v0 }
  0x7d   :  { %2397 = vmatpush3.bf16.msra.mxu1 %v3089_v13 }
  0x7e   :  { %204 = vmatmul.mubr.f32.vlgmr.msra.gmra.mrb[0].mxu0 %v87_v14  ;;  %2422 = vmatprep.subr.bf16.mxu1 %v2952_v0 }
  0x7f   :  { %209 = vmatprep.mubr.f32.mxu0 %v2953_v1  ;;  %2400 = vmatpush3.bf16.msra.mxu0 %v3092_v15 }
  0x80   :  { %2401 = vmatprep.subr.bf16.mxu0 %v2952_v0  ;;  %1815 = vmatmul.mubr.f32.vlgmr.msra.gmra.mrb[0].mxu1 %v2953_v1 }
  0x81   :  { %2424 = vmatpush3.bf16.msra.mxu1 %v3062_v21  ;;  %1884 = vmatprep.mubr.msk.f32.mxu1 %vm2954_vm0, %v2953_v1 }
  0x82   :  { %210 = vmatmul.mubr.f32.gmra.mrb[2].mxu0 %v88_v18  ;;  %2425 = vmatprep.subr.bf16.mxu1 %v2952_v0 }
  0x83   :  { %215 = vmatprep.mubr.f32.mxu0 %v2953_v1  ;;  %2403 = vmatpush3.bf16.msra.mxu0 %v3098_v19 }
  0x84   :  { %2404 = vmatprep.subr.bf16.mxu0 %v2952_v0 }
  0x85   :  { %2427 = vmatpush3.bf16.msra.mxu1 %v3065_v26 }
  0x86   :  { %216 = vmatmul.mubr.f32.gmra.mrb[4].mxu0 %v89_v23  ;;  %2428 = vmatprep.subr.bf16.mxu1 %v2952_v0 }
  0x87   :  { %221 = vmatprep.mubr.f32.mxu0 %v2953_v1  ;;  %2406 = vmatpush3.bf16.msra.mxu0 %v3106_v24 }
  0x88   :  { %2407 = vmatprep.subr.bf16.mxu0 %v2952_v0 }
  0x89   :  { %2430 = vmatpush3.bf16.msra.mxu1 %v3069_v35 }
  0x8a   :  { %222 = vmatmul.mubr.f32.gmra.mrb[6].mxu0 %v90_v28  ;;  %2431 = vmatprep.subr.bf16.mxu1 %v2952_v0 }
  0x8b   :  { %227 = vmatprep.mubr.f32.mxu0 %v2953_v1  ;;  %2409 = vmatpush3.bf16.msra.mxu0 %v3115_v29 }
  0x8c   :  { %2410 = vmatprep.subr.bf16.mxu0 %v2952_v0 }
  0x8d   :  { %2433 = vmatpush3.bf16.msra.mxu1 %v3073_v44 }
  0x8e   :  { %228 = vmatmul.mubr.f32.gmra.mrb[8].mxu0 %v91_v32  ;;  %2434 = vmatprep.subr.bf16.mxu1 %v2952_v0 }
  0x8f   :  { %233 = vmatprep.mubr.f32.mxu0 %v2953_v1  ;;  %2412 = vmatpush3.bf16.msra.mxu0 %v3122_v33 }
  0x90   :  { %2413 = vmatprep.subr.bf16.mxu0 %v2952_v0 }
  0x91   :  { %2436 = vmatpush3.bf16.msra.mxu1 %v3077_v53 }
  0x92   :  { %234 = vmatmul.mubr.f32.gmra.mrb[10].mxu0 %v92_v37  ;;  %2437 = vmatprep.subr.bf16.mxu1 %v2952_v0 }
  0x93   :  { %239 = vmatprep.mubr.f32.mxu0 %v2953_v1  ;;  %2415 = vmatpush3.bf16.msra.mxu0 %v3129_v38 }
  0x94   :  { %2416 = vmatprep.subr.bf16.mxu0 %v2952_v0 }
  0x95   :  { %2439 = vmatpush3.bf16.msra.mxu1 %v3081_v62 }
  0x96   :  { %240 = vmatmul.mubr.f32.gmra.mrb[12].mxu0 %v93_v41  ;;  %2440 = vmatprep.subr.bf16.mxu1 %v2952_v0 }
  0x97   :  { %245 = vmatprep.mubr.f32.mxu0 %v2953_v1  ;;  %2418 = vmatpush3.bf16.msra.mxu0 %v3136_v42 }
  0x98   :  { %2419 = vmatprep.subr.bf16.mxu0 %v2952_v0 }
  0x99   :  { %2442 = vmatpush3.bf16.msra.mxu1 %v3085_v7 }
  0x9a   :  { %246 = vmatmul.mubr.f32.gmra.mrb[14].mxu0 %v94_v46  ;;  %2443 = vmatprep.subr.bf16.mxu1 %v2952_v0 }
  0x9b   :  { %2421 = vmatpush3.bf16.msra.mxu0 %v3143_v47  ;;  %1849 = vmatprep.mubr.msk.f32.mxu0 %vm2954_vm0, %v2953_v1 }
  0x9c   :  { %2446 = vmatprep.subr.bf16.mxu0 %v2952_v0 }
  0x9d   :  { %2445 = vmatpush3.bf16.msra.mxu1 %v3089_v13 }
  0x9e   :  { %1850 = vmatmul.mubr.f32.vlgmr.msra.gmra.mrb[16].mxu0 %v2953_v1  ;;  %2470 = vmatprep.subr.bf16.mxu1 %v2952_v0 }
  0x9f   :  { %2448 = vmatpush3.bf16.msra.mxu0 %v3092_v15  ;;  %1919 = vmatprep.mubr.msk.f32.mxu0 %vm2954_vm0, %v2953_v1 }
  0xa0   :  { %2449 = vmatprep.subr.bf16.mxu0 %v2952_v0 }
  0xa3   :  { %2451 = vmatpush3.bf16.msra.mxu0 %v3098_v19 }
  0xa4   :  { %2452 = vmatprep.subr.bf16.mxu0 %v2952_v0 }
  0xa7   :  { %2454 = vmatpush3.bf16.msra.mxu0 %v3106_v24 }
  0xa8   :  { %2455 = vmatprep.subr.bf16.mxu0 %v2952_v0 }
  0xab   :  { %2457 = vmatpush3.bf16.msra.mxu0 %v3115_v29 }
  0xac   :  { %2458 = vmatprep.subr.bf16.mxu0 %v2952_v0 }
  0xaf   :  { %2460 = vmatpush3.bf16.msra.mxu0 %v3122_v33 }
  0xb0   :  { %2461 = vmatprep.subr.bf16.mxu0 %v2952_v0 }
  0xb3   :  { %2463 = vmatpush3.bf16.msra.mxu0 %v3129_v38 }
  0xb4   :  { %2464 = vmatprep.subr.bf16.mxu0 %v2952_v0 }
  0xb7   :  { %2466 = vmatpush3.bf16.msra.mxu0 %v3136_v42 }
  0xb8   :  { %2467 = vmatprep.subr.bf16.mxu0 %v2952_v0 }
  0xbb   :  { %2469 = vmatpush3.bf16.msra.mxu0 %v3143_v47 }
  0xbc   :  { %2494 = vmatprep.subr.bf16.mxu0 %v2952_v0 }
 0x151   :  { %v205_v56 = vpop.f32.mrb[0].mxu0 }
 0x152   :  { %v206_v57 = vadd.f32 %v205_v56, %v132_v54  ;;  %v207_v58 = vpop.f32.mrb[1].mxu0 }
 0x153   :  { %v3174_v59 = vadd.f32 %v207_v58, %v136_v55  ;;  %v369_v60 = vpop.f32.mrb[0].mxu1 }
 0x154   :  { %v373_v63 = vadd.f32 %v369_v60, %v206_v57  ;;  %v1816_v2 = vpop.f32.mrb[1].mxu1 }
 0x155   :  { %v211_v61 = vpop.f32.mrb[2].mxu0 }
 0x156   :  { %v3176_v3 = vadd.f32 %v211_v61, %v132_v54  ;;  %v213_v4 = vpop.f32.mrb[3].mxu0  ;;  %2771 = vtanh.f32 %v373_v63 }
 0x157   :  { %v3178_v5 = vadd.f32 %v213_v4, %v136_v55 }
 0x159   :  { %v217_v6 = vpop.f32.mrb[4].mxu0 }
 0x15a   :  { %v3180_v8 = vadd.f32 %v217_v6, %v132_v54  ;;  %v219_v9 = vpop.f32.mrb[5].mxu0 }
 0x15b   :  { %v3182_v10 = vadd.f32 %v219_v9, %v136_v55 }
 0x15d   :  { %v223_v11 = vpop.f32.mrb[6].mxu0 }
 0x15e   :  { %v3184_v12 = vadd.f32 %v223_v11, %v132_v54  ;;  %v225_v14 = vpop.f32.mrb[7].mxu0 }
 0x15f   :  { %v3186_v16 = vadd.f32 %v225_v14, %v136_v55 }
 0x160   :  { %v2772_v17 = vpop.eup %2771 }
 0x161   :  { %v229_v18 = vpop.f32.mrb[8].mxu0  ;;  %447 = vst [vmem:[#allocation11] sm:$0xff] %v2772_v17  ;;  %1885 = vmatmul.mubr.f32.vlgmr.msra.gmra.mrb[2].mxu1 %v2772_v17 }
 0x162   :  { %v3188_v20 = vadd.f32 %v229_v18, %v132_v54  ;;  %v231_v22 = vpop.f32.mrb[9].mxu0  ;;  %2472 = vmatpush3.bf16.msra.mxu1 %v3062_v21  ;;  %1954 = vmatprep.mubr.msk.f32.mxu1 %vm2954_vm0, %v2953_v1 }
 0x163   :  { %v3190_v23 = vadd.f32 %v231_v22, %v136_v55  ;;  %2473 = vmatprep.subr.bf16.mxu1 %v2952_v0 }
 0x165   :  { %v235_v25 = vpop.f32.mrb[10].mxu0 }
 0x166   :  { %v3196_v27 = vadd.f32 %v235_v25, %v132_v54  ;;  %v237_v28 = vpop.f32.mrb[11].mxu0  ;;  %2475 = vmatpush3.bf16.msra.mxu1 %v3065_v26 }
 0x167   :  { %v3198_v30 = vadd.f32 %v237_v28, %v136_v55  ;;  %2476 = vmatprep.subr.bf16.mxu1 %v2952_v0 }
 0x169   :  { %v241_v31 = vpop.f32.mrb[12].mxu0 }
 0x16a   :  { %v3202_v32 = vadd.f32 %v241_v31, %v132_v54  ;;  %v243_v34 = vpop.f32.mrb[13].mxu0  ;;  %2478 = vmatpush3.bf16.msra.mxu1 %v3069_v35 }
 0x16b   :  { %v244_v36 = vadd.f32 %v243_v34, %v136_v55  ;;  %2479 = vmatprep.subr.bf16.mxu1 %v2952_v0 }
 0x16d   :  { %v247_v37 = vpop.f32.mrb[14].mxu0 }
 0x16e   :  { %v3206_v39 = vadd.f32 %v247_v37, %v132_v54  ;;  %v249_v40 = vpop.f32.mrb[15].mxu0  ;;  %2481 = vmatpush3.bf16.msra.mxu1 %v3073_v44 }
 0x16f   :  { %v250_v41 = vadd.f32 %v249_v40, %v136_v55  ;;  %2482 = vmatprep.subr.bf16.mxu1 %v2952_v0 }
 0x171   :  { %v441_v43 = vpop.f32.mrb[16].mxu0 }
 0x172   :  { %v445_v45 = vadd.f32 %v441_v43, %v250_v41  ;;  %v1851_v46 = vpop.f32.mrb[17].mxu0  ;;  %2484 = vmatpush3.bf16.msra.mxu1 %v3077_v53 }
 0x173   :  { %2485 = vmatprep.subr.bf16.mxu1 %v2952_v0 }
 0x174   :  { %2773 = vtanh.f32 %v445_v45 }
 0x176   :  { %2487 = vmatpush3.bf16.msra.mxu1 %v3081_v62 }
 0x177   :  { %2488 = vmatprep.subr.bf16.mxu1 %v2952_v0 }
 0x17a   :  { %2490 = vmatpush3.bf16.msra.mxu1 %v3085_v7 }
 0x17b   :  { %2491 = vmatprep.subr.bf16.mxu1 %v2952_v0 }
 0x17e   :  { %v2774_v48 = vpop.eup %2773  ;;  %2493 = vmatpush3.bf16.msra.mxu1 %v3089_v13 }
 0x17f   :  { %448 = vst [vmem:[#allocation11 + $0x78] sm:$0xff] %v2774_v48  ;;  %1920 = vmatmul.mubr.f32.vlgmr.msra.gmra.mrb[18].mxu0 %v2774_v48  ;;  %2518 = vmatprep.subr.bf16.mxu1 %v2952_v0 }
 0x180   :  { %2496 = vmatpush3.bf16.msra.mxu0 %v3092_v15  ;;  %1989 = vmatprep.mubr.msk.f32.mxu0 %vm2954_vm0, %v2953_v1 }
 0x181   :  { %2497 = vmatprep.subr.bf16.mxu0 %v2952_v0 }
 0x184   :  { %2499 = vmatpush3.bf16.msra.mxu0 %v3098_v19 }
 0x185   :  { %2500 = vmatprep.subr.bf16.mxu0 %v2952_v0 }
 0x188   :  { %2502 = vmatpush3.bf16.msra.mxu0 %v3106_v24 }
 0x189   :  { %2503 = vmatprep.subr.bf16.mxu0 %v2952_v0 }
 0x18c   :  { %2505 = vmatpush3.bf16.msra.mxu0 %v3115_v29 }
 0x18d   :  { %2506 = vmatprep.subr.bf16.mxu0 %v2952_v0 }
 0x190   :  { %2508 = vmatpush3.bf16.msra.mxu0 %v3122_v33 }
 0x191   :  { %2509 = vmatprep.subr.bf16.mxu0 %v2952_v0 }
 0x194   :  { %2511 = vmatpush3.bf16.msra.mxu0 %v3129_v38 }
 0x195   :  { %2512 = vmatprep.subr.bf16.mxu0 %v2952_v0 }
 0x198   :  { %2514 = vmatpush3.bf16.msra.mxu0 %v3136_v42 }
 0x199   :  { %2515 = vmatprep.subr.bf16.mxu0 %v2952_v0 }
 0x19c   :  { %2517 = vmatpush3.bf16.msra.mxu0 %v3143_v47 }
 0x19d   :  { %2542 = vmatprep.subr.bf16.mxu0 %v2952_v0 }
 0x234   :  { %v519_v49 = vpop.f32.mrb[2].mxu1 }
 0x235   :  { %v523_v50 = vadd.f32 %v519_v49, %v3176_v3  ;;  %v1886_v51 = vpop.f32.mrb[3].mxu1 }
 0x237   :  { %2775 = vtanh.f32 %v523_v50 }
 0x241   :  { %v2776_v52 = vpop.eup %2775 }
 0x242   :  { %597 = vst [vmem:[#allocation11 + $0x10] sm:$0xff] %v2776_v52  ;;  %1955 = vmatmul.mubr.f32.vlgmr.msra.gmra.mrb[4].mxu1 %v2776_v52 }
 0x243   :  { %2520 = vmatpush3.bf16.msra.mxu1 %v3062_v21  ;;  %2024 = vmatprep.mubr.msk.f32.mxu1 %vm2954_vm0, %v2953_v1 }
 0x244   :  { %2521 = vmatprep.subr.bf16.mxu1 %v2952_v0 }
 0x247   :  { %2523 = vmatpush3.bf16.msra.mxu1 %v3065_v26 }
 0x248   :  { %2524 = vmatprep.subr.bf16.mxu1 %v2952_v0 }
 0x24b   :  { %2526 = vmatpush3.bf16.msra.mxu1 %v3069_v35 }
 0x24c   :  { %2527 = vmatprep.subr.bf16.mxu1 %v2952_v0 }
 0x24f   :  { %2529 = vmatpush3.bf16.msra.mxu1 %v3073_v44 }
 0x250   :  { %2530 = vmatprep.subr.bf16.mxu1 %v2952_v0 }
 0x252   :  { %v591_v54 = vpop.f32.mrb[18].mxu0 }
 0x253   :  { %v595_v55 = vadd.f32 %v591_v54, %v244_v36  ;;  %v1921_v56 = vpop.f32.mrb[19].mxu0  ;;  %2532 = vmatpush3.bf16.msra.mxu1 %v3077_v53 }
 0x254   :  { %2533 = vmatprep.subr.bf16.mxu1 %v2952_v0 }
 0x255   :  { %2777 = vtanh.f32 %v595_v55 }
 0x257   :  { %2535 = vmatpush3.bf16.msra.mxu1 %v3081_v62 }
 0x258   :  { %2536 = vmatprep.subr.bf16.mxu1 %v2952_v0 }
 0x25b   :  { %2538 = vmatpush3.bf16.msra.mxu1 %v3085_v7 }
 0x25c   :  { %2539 = vmatprep.subr.bf16.mxu1 %v2952_v0 }
 0x25f   :  { %v2778_v57 = vpop.eup %2777  ;;  %2541 = vmatpush3.bf16.msra.mxu1 %v3089_v13 }
 0x260   :  { %598 = vst [vmem:[#allocation11 + $0x68] sm:$0xff] %v2778_v57  ;;  %1990 = vmatmul.mubr.f32.vlgmr.msra.gmra.mrb[20].mxu0 %v2778_v57  ;;  %2566 = vmatprep.subr.bf16.mxu1 %v2952_v0 }
 0x261   :  { %2544 = vmatpush3.bf16.msra.mxu0 %v3092_v15  ;;  %2059 = vmatprep.mubr.msk.f32.mxu0 %vm2954_vm0, %v2953_v1 }
 0x262   :  { %2545 = vmatprep.subr.bf16.mxu0 %v2952_v0 }
 0x265   :  { %2547 = vmatpush3.bf16.msra.mxu0 %v3098_v19 }
 0x266   :  { %2548 = vmatprep.subr.bf16.mxu0 %v2952_v0 }
 0x269   :  { %2550 = vmatpush3.bf16.msra.mxu0 %v3106_v24 }
 0x26a   :  { %2551 = vmatprep.subr.bf16.mxu0 %v2952_v0 }
 0x26d   :  { %2553 = vmatpush3.bf16.msra.mxu0 %v3115_v29 }
 0x26e   :  { %2554 = vmatprep.subr.bf16.mxu0 %v2952_v0 }
 0x271   :  { %2556 = vmatpush3.bf16.msra.mxu0 %v3122_v33 }
 0x272   :  { %2557 = vmatprep.subr.bf16.mxu0 %v2952_v0 }
 0x275   :  { %2559 = vmatpush3.bf16.msra.mxu0 %v3129_v38 }
 0x276   :  { %2560 = vmatprep.subr.bf16.mxu0 %v2952_v0 }
 0x279   :  { %2562 = vmatpush3.bf16.msra.mxu0 %v3136_v42 }
 0x27a   :  { %2563 = vmatprep.subr.bf16.mxu0 %v2952_v0 }
 0x27d   :  { %2565 = vmatpush3.bf16.msra.mxu0 %v3143_v47 }
 0x27e   :  { %2590 = vmatprep.subr.bf16.mxu0 %v2952_v0 }
 0x315   :  { %v669_v58 = vpop.f32.mrb[4].mxu1 }
 0x316   :  { %v673_v60 = vadd.f32 %v669_v58, %v3180_v8  ;;  %v1956_v61 = vpop.f32.mrb[5].mxu1 }
 0x318   :  { %2779 = vtanh.f32 %v673_v60 }
 0x322   :  { %v2780_v63 = vpop.eup %2779 }
 0x323   :  { %747 = vst [vmem:[#allocation11 + $0x20] sm:$0xff] %v2780_v63  ;;  %2025 = vmatmul.mubr.f32.vlgmr.msra.gmra.mrb[6].mxu1 %v2780_v63 }
 0x324   :  { %2568 = vmatpush3.bf16.msra.mxu1 %v3062_v21  ;;  %2094 = vmatprep.mubr.msk.f32.mxu1 %vm2954_vm0, %v2953_v1 }
 0x325   :  { %2569 = vmatprep.subr.bf16.mxu1 %v2952_v0 }
 0x328   :  { %2571 = vmatpush3.bf16.msra.mxu1 %v3065_v26 }
 0x329   :  { %2572 = vmatprep.subr.bf16.mxu1 %v2952_v0 }
 0x32c   :  { %2574 = vmatpush3.bf16.msra.mxu1 %v3069_v35 }
 0x32d   :  { %2575 = vmatprep.subr.bf16.mxu1 %v2952_v0 }
 0x330   :  { %2577 = vmatpush3.bf16.msra.mxu1 %v3073_v44 }
 0x331   :  { %2578 = vmatprep.subr.bf16.mxu1 %v2952_v0 }
 0x333   :  { %v741_v2 = vpop.f32.mrb[20].mxu0 }
 0x334   :  { %v745_v3 = vadd.f32 %v741_v2, %v3198_v30  ;;  %v1991_v4 = vpop.f32.mrb[21].mxu0  ;;  %2580 = vmatpush3.bf16.msra.mxu1 %v3077_v53 }
 0x335   :  { %2581 = vmatprep.subr.bf16.mxu1 %v2952_v0 }
 0x336   :  { %2781 = vtanh.f32 %v745_v3 }
 0x338   :  { %2583 = vmatpush3.bf16.msra.mxu1 %v3081_v62 }
 0x339   :  { %2584 = vmatprep.subr.bf16.mxu1 %v2952_v0 }
 0x33c   :  { %2586 = vmatpush3.bf16.msra.mxu1 %v3085_v7 }
 0x33d   :  { %2587 = vmatprep.subr.bf16.mxu1 %v2952_v0 }
 0x340   :  { %v2782_v6 = vpop.eup %2781  ;;  %2589 = vmatpush3.bf16.msra.mxu1 %v3089_v13 }
 0x341   :  { %748 = vst [vmem:[#allocation11 + $0x58] sm:$0xff] %v2782_v6  ;;  %2060 = vmatmul.mubr.f32.vlgmr.msra.gmra.mrb[22].mxu0 %v2782_v6  ;;  %2614 = vmatprep.subr.bf16.mxu1 %v2952_v0 }
 0x342   :  { %2592 = vmatpush3.bf16.msra.mxu0 %v3092_v15  ;;  %2129 = vmatprep.mubr.msk.f32.mxu0 %vm2954_vm0, %v2953_v1 }
 0x343   :  { %2593 = vmatprep.subr.bf16.mxu0 %v2952_v0 }
 0x346   :  { %2595 = vmatpush3.bf16.msra.mxu0 %v3098_v19 }
 0x347   :  { %2596 = vmatprep.subr.bf16.mxu0 %v2952_v0 }
 0x34a   :  { %2598 = vmatpush3.bf16.msra.mxu0 %v3106_v24 }
 0x34b   :  { %2599 = vmatprep.subr.bf16.mxu0 %v2952_v0 }
 0x34e   :  { %2601 = vmatpush3.bf16.msra.mxu0 %v3115_v29 }
 0x34f   :  { %2602 = vmatprep.subr.bf16.mxu0 %v2952_v0 }
 0x352   :  { %2604 = vmatpush3.bf16.msra.mxu0 %v3122_v33 }
 0x353   :  { %2605 = vmatprep.subr.bf16.mxu0 %v2952_v0 }
 0x356   :  { %2607 = vmatpush3.bf16.msra.mxu0 %v3129_v38 }
 0x357   :  { %2608 = vmatprep.subr.bf16.mxu0 %v2952_v0 }
 0x35a   :  { %2610 = vmatpush3.bf16.msra.mxu0 %v3136_v42 }
 0x35b   :  { %2611 = vmatprep.subr.bf16.mxu0 %v2952_v0 }
 0x35e   :  { %2613 = vmatpush3.bf16.msra.mxu0 %v3143_v47 }
 0x35f   :  { %2638 = vmatprep.subr.bf16.mxu0 %v2952_v0 }
 0x3f6   :  { %v819_v8 = vpop.f32.mrb[6].mxu1 }
 0x3f7   :  { %v823_v9 = vadd.f32 %v819_v8, %v3184_v12  ;;  %v2026_v11 = vpop.f32.mrb[7].mxu1 }
 0x3f9   :  { %2783 = vtanh.f32 %v823_v9 }
 0x403   :  { %v2784_v14 = vpop.eup %2783 }
 0x404   :  { %897 = vst [vmem:[#allocation11 + $0x30] sm:$0xff] %v2784_v14  ;;  %2095 = vmatmul.mubr.f32.vlgmr.msra.gmra.mrb[8].mxu1 %v2784_v14 }
 0x405   :  { %2616 = vmatpush3.bf16.msra.mxu1 %v3062_v21  ;;  %2164 = vmatprep.mubr.msk.f32.mxu1 %vm2954_vm0, %v2953_v1 }
 0x406   :  { %2617 = vmatprep.subr.bf16.mxu1 %v2952_v0 }
 0x409   :  { %2619 = vmatpush3.bf16.msra.mxu1 %v3065_v26 }
 0x40a   :  { %2620 = vmatprep.subr.bf16.mxu1 %v2952_v0 }
 0x40d   :  { %2622 = vmatpush3.bf16.msra.mxu1 %v3069_v35 }
 0x40e   :  { %2623 = vmatprep.subr.bf16.mxu1 %v2952_v0 }
 0x411   :  { %2625 = vmatpush3.bf16.msra.mxu1 %v3073_v44 }
 0x412   :  { %2626 = vmatprep.subr.bf16.mxu1 %v2952_v0 }
 0x414   :  { %v891_v12 = vpop.f32.mrb[22].mxu0 }
 0x415   :  { %v895_v17 = vadd.f32 %v891_v12, %v3190_v23  ;;  %v2061_v18 = vpop.f32.mrb[23].mxu0  ;;  %2628 = vmatpush3.bf16.msra.mxu1 %v3077_v53 }
 0x416   :  { %2629 = vmatprep.subr.bf16.mxu1 %v2952_v0 }
 0x417   :  { %2785 = vtanh.f32 %v895_v17 }
 0x419   :  { %2631 = vmatpush3.bf16.msra.mxu1 %v3081_v62 }
 0x41a   :  { %2632 = vmatprep.subr.bf16.mxu1 %v2952_v0 }
 0x41d   :  { %2634 = vmatpush3.bf16.msra.mxu1 %v3085_v7 }
 0x41e   :  { %2635 = vmatprep.subr.bf16.mxu1 %v2952_v0 }
 0x421   :  { %v2786_v22 = vpop.eup %2785  ;;  %2637 = vmatpush3.bf16.msra.mxu1 %v3089_v13 }
 0x422   :  { %898 = vst [vmem:[#allocation11 + $0x48] sm:$0xff] %v2786_v22  ;;  %2130 = vmatmul.mubr.f32.vlgmr.msra.gmra.mrb[24].mxu0 %v2786_v22  ;;  %2662 = vmatprep.subr.bf16.mxu1 %v2952_v0 }
 0x423   :  { %2640 = vmatpush3.bf16.msra.mxu0 %v3092_v15  ;;  %2199 = vmatprep.mubr.msk.f32.mxu0 %vm2954_vm0, %v2953_v1 }
 0x424   :  { %2641 = vmatprep.subr.bf16.mxu0 %v2952_v0 }
 0x427   :  { %2643 = vmatpush3.bf16.msra.mxu0 %v3098_v19 }
 0x428   :  { %2644 = vmatprep.subr.bf16.mxu0 %v2952_v0 }
 0x42b   :  { %2646 = vmatpush3.bf16.msra.mxu0 %v3106_v24 }
 0x42c   :  { %2647 = vmatprep.subr.bf16.mxu0 %v2952_v0 }
 0x42f   :  { %2649 = vmatpush3.bf16.msra.mxu0 %v3115_v29 }
 0x430   :  { %2650 = vmatprep.subr.bf16.mxu0 %v2952_v0 }
 0x433   :  { %2652 = vmatpush3.bf16.msra.mxu0 %v3122_v33 }
 0x434   :  { %2653 = vmatprep.subr.bf16.mxu0 %v2952_v0 }
 0x437   :  { %2655 = vmatpush3.bf16.msra.mxu0 %v3129_v38 }
 0x438   :  { %2656 = vmatprep.subr.bf16.mxu0 %v2952_v0 }
 0x43b   :  { %2658 = vmatpush3.bf16.msra.mxu0 %v3136_v42 }
 0x43c   :  { %2659 = vmatprep.subr.bf16.mxu0 %v2952_v0 }
 0x43f   :  { %2661 = vmatpush3.bf16.msra.mxu0 %v3143_v47 }
 0x440   :  { %2686 = vmatprep.subr.bf16.mxu0 %v2952_v0 }
 0x4d7   :  { %v967_v23 = vpop.f32.mrb[8].mxu1 }
 0x4d8   :  { %v971_v25 = vadd.f32 %v967_v23, %v3188_v20  ;;  %v2096_v28 = vpop.f32.mrb[9].mxu1 }
 0x4da   :  { %2787 = vtanh.f32 %v971_v25 }
 0x4e4   :  { %v2788_v30 = vpop.eup %2787 }
 0x4e5   :  { %1045 = vst [vmem:[#allocation11 + $0x40] sm:$0xff] %v2788_v30  ;;  %2165 = vmatmul.mubr.f32.vlgmr.msra.gmra.mrb[10].mxu1 %v2788_v30 }
 0x4e6   :  { %2664 = vmatpush3.bf16.msra.mxu1 %v3062_v21  ;;  %2234 = vmatprep.mubr.msk.f32.mxu1 %vm2954_vm0, %v2953_v1 }
 0x4e7   :  { %2665 = vmatprep.subr.bf16.mxu1 %v2952_v0 }
 0x4ea   :  { %2667 = vmatpush3.bf16.msra.mxu1 %v3065_v26 }
 0x4eb   :  { %2668 = vmatprep.subr.bf16.mxu1 %v2952_v0 }
 0x4ee   :  { %2670 = vmatpush3.bf16.msra.mxu1 %v3069_v35 }
 0x4ef   :  { %2671 = vmatprep.subr.bf16.mxu1 %v2952_v0 }
 0x4f2   :  { %2673 = vmatpush3.bf16.msra.mxu1 %v3073_v44 }
 0x4f3   :  { %2674 = vmatprep.subr.bf16.mxu1 %v2952_v0 }
 0x4f5   :  { %v1039_v20 = vpop.f32.mrb[24].mxu0 }
 0x4f6   :  { %v1043_v31 = vadd.f32 %v1039_v20, %v3186_v16  ;;  %v2131_v34 = vpop.f32.mrb[25].mxu0  ;;  %2676 = vmatpush3.bf16.msra.mxu1 %v3077_v53 }
 0x4f7   :  { %2677 = vmatprep.subr.bf16.mxu1 %v2952_v0 }
 0x4f8   :  { %2789 = vtanh.f32 %v1043_v31 }
 0x4fa   :  { %2679 = vmatpush3.bf16.msra.mxu1 %v3081_v62 }
 0x4fb   :  { %2680 = vmatprep.subr.bf16.mxu1 %v2952_v0 }
 0x4fe   :  { %2682 = vmatpush3.bf16.msra.mxu1 %v3085_v7 }
 0x4ff   :  { %2683 = vmatprep.subr.bf16.mxu1 %v2952_v0 }
 0x502   :  { %v2790_v36 = vpop.eup %2789  ;;  %2685 = vmatpush3.bf16.msra.mxu1 %v3089_v13 }
 0x503   :  { %1046 = vst [vmem:[#allocation11 + $0x38] sm:$0xff] %v2790_v36  ;;  %2200 = vmatmul.mubr.f32.vlgmr.msra.gmra.mrb[26].mxu0 %v2790_v36  ;;  %2710 = vmatprep.subr.bf16.mxu1 %v2952_v0 }
 0x504   :  { %2688 = vmatpush3.bf16.msra.mxu0 %v3092_v15  ;;  %2269 = vmatprep.mubr.msk.f32.mxu0 %vm2954_vm0, %v2953_v1 }
 0x505   :  { %2689 = vmatprep.subr.bf16.mxu0 %v2952_v0 }
 0x508   :  { %2691 = vmatpush3.bf16.msra.mxu0 %v3098_v19 }
 0x509   :  { %2692 = vmatprep.subr.bf16.mxu0 %v2952_v0 }
 0x50c   :  { %2694 = vmatpush3.bf16.msra.mxu0 %v3106_v24 }
 0x50d   :  { %2695 = vmatprep.subr.bf16.mxu0 %v2952_v0 }
 0x510   :  { %2697 = vmatpush3.bf16.msra.mxu0 %v3115_v29 }
 0x511   :  { %2698 = vmatprep.subr.bf16.mxu0 %v2952_v0 }
 0x514   :  { %2700 = vmatpush3.bf16.msra.mxu0 %v3122_v33 }
 0x515   :  { %2701 = vmatprep.subr.bf16.mxu0 %v2952_v0 }
 0x518   :  { %2703 = vmatpush3.bf16.msra.mxu0 %v3129_v38 }
 0x519   :  { %2704 = vmatprep.subr.bf16.mxu0 %v2952_v0 }
 0x51c   :  { %2706 = vmatpush3.bf16.msra.mxu0 %v3136_v42 }
 0x51d   :  { %2707 = vmatprep.subr.bf16.mxu0 %v2952_v0 }
 0x520   :  { %2709 = vmatpush3.bf16.msra.mxu0 %v3143_v47 }
 0x521   :  { %2734 = vmatprep.subr.bf16.mxu0 %v2952_v0 }
 0x5b8   :  { %v1115_v16 = vpop.f32.mrb[10].mxu1 }
 0x5b9   :  { %v1119_v37 = vadd.f32 %v1115_v16, %v3196_v27  ;;  %v2166_v40 = vpop.f32.mrb[11].mxu1 }
 0x5bb   :  { %2791 = vtanh.f32 %v1119_v37 }
 0x5c5   :  { %v2792_v41 = vpop.eup %2791 }
 0x5c6   :  { %1193 = vst [vmem:[#allocation11 + $0x50] sm:$0xff] %v2792_v41  ;;  %2235 = vmatmul.mubr.f32.vlgmr.msra.gmra.mrb[12].mxu1 %v2792_v41 }
 0x5c7   :  { %2712 = vmatpush3.bf16.msra.mxu1 %v3062_v21  ;;  %2304 = vmatprep.mubr.msk.f32.mxu1 %vm2954_vm0, %v2953_v1 }
 0x5c8   :  { %2713 = vmatprep.subr.bf16.mxu1 %v2952_v0 }
 0x5cb   :  { %2715 = vmatpush3.bf16.msra.mxu1 %v3065_v26 }
 0x5cc   :  { %2716 = vmatprep.subr.bf16.mxu1 %v2952_v0 }
 0x5cf   :  { %2718 = vmatpush3.bf16.msra.mxu1 %v3069_v35 }
 0x5d0   :  { %2719 = vmatprep.subr.bf16.mxu1 %v2952_v0 }
 0x5d3   :  { %2721 = vmatpush3.bf16.msra.mxu1 %v3073_v44 }
 0x5d4   :  { %2722 = vmatprep.subr.bf16.mxu1 %v2952_v0 }
 0x5d6   :  { %v1187_v27 = vpop.f32.mrb[26].mxu0 }
 0x5d7   :  { %v1191_v21 = vadd.f32 %v1187_v27, %v3182_v10  ;;  %v2201_v43 = vpop.f32.mrb[27].mxu0  ;;  %2724 = vmatpush3.bf16.msra.mxu1 %v3077_v53 }
 0x5d8   :  { %2725 = vmatprep.subr.bf16.mxu1 %v2952_v0 }
 0x5d9   :  { %2793 = vtanh.f32 %v1191_v21 }
 0x5db   :  { %2727 = vmatpush3.bf16.msra.mxu1 %v3081_v62 }
 0x5dc   :  { %2728 = vmatprep.subr.bf16.mxu1 %v2952_v0 }
 0x5df   :  { %2730 = vmatpush3.bf16.msra.mxu1 %v3085_v7 }
 0x5e0   :  { %2731 = vmatprep.subr.bf16.mxu1 %v2952_v0 }
 0x5e3   :  { %v2794_v26 = vpop.eup %2793  ;;  %2733 = vmatpush3.bf16.msra.mxu1 %v3089_v13 }
 0x5e4   :  { %1194 = vst [vmem:[#allocation11 + $0x28] sm:$0xff] %v2794_v26  ;;  %2270 = vmatmul.mubr.f32.vlgmr.msra.gmra.mrb[28].mxu0 %v2794_v26 }
 0x5e5   :  { %2736 = vmatpush3.bf16.msra.mxu0 %v3092_v15  ;;  %2339 = vmatprep.mubr.msk.f32.mxu0 %vm2954_vm0, %v2953_v1 }
 0x5e6   :  { %2737 = vmatprep.subr.bf16.mxu0 %v2952_v0 }
 0x5e9   :  { %2739 = vmatpush3.bf16.msra.mxu0 %v3098_v19 }
 0x5ea   :  { %2740 = vmatprep.subr.bf16.mxu0 %v2952_v0 }
 0x5ed   :  { %2742 = vmatpush3.bf16.msra.mxu0 %v3106_v24 }
 0x5ee   :  { %2743 = vmatprep.subr.bf16.mxu0 %v2952_v0 }
 0x5f1   :  { %2745 = vmatpush3.bf16.msra.mxu0 %v3115_v29 }
 0x5f2   :  { %2746 = vmatprep.subr.bf16.mxu0 %v2952_v0 }
 0x5f5   :  { %2748 = vmatpush3.bf16.msra.mxu0 %v3122_v33 }
 0x5f6   :  { %2749 = vmatprep.subr.bf16.mxu0 %v2952_v0 }
 0x5f9   :  { %2751 = vmatpush3.bf16.msra.mxu0 %v3129_v38 }
 0x5fa   :  { %2752 = vmatprep.subr.bf16.mxu0 %v2952_v0 }
 0x5fd   :  { %2754 = vmatpush3.bf16.msra.mxu0 %v3136_v42 }
 0x5fe   :  { %2755 = vmatprep.subr.bf16.mxu0 %v2952_v0 }
 0x601   :  { %2757 = vmatpush3.bf16.msra.mxu0 %v3143_v47 }
 0x699   :  { %v1263_v1 = vpop.f32.mrb[12].mxu1 }
 0x69a   :  { %v1267_v35 = vadd.f32 %v1263_v1, %v3202_v32  ;;  %v2236_v44 = vpop.f32.mrb[13].mxu1 }
 0x69c   :  { %2795 = vtanh.f32 %v1267_v35 }
 0x6a6   :  { %v2796_v53 = vpop.eup %2795 }
 0x6a7   :  { %1341 = vst [vmem:[#allocation11 + $0x60] sm:$0xff] %v2796_v53  ;;  %2305 = vmatmul.mubr.f32.vlgmr.msra.gmra.mrb[14].mxu1 %v2796_v53 }
 0x6b7   :  { %v1335_v62 = vpop.f32.mrb[28].mxu0 }
 0x6b8   :  { %v1339_v7 = vadd.f32 %v1335_v62, %v3178_v5  ;;  %v2271_v13 = vpop.f32.mrb[29].mxu0 }
 0x6ba   :  { %2797 = vtanh.f32 %v1339_v7 }
 0x6c4   :  { %v2798_v15 = vpop.eup %2797 }
 0x6c5   :  { %1342 = vst [vmem:[#allocation11 + $0x18] sm:$0xff] %v2798_v15  ;;  %2340 = vmatmul.mubr.f32.vlgmr.msra.gmra.mrb[30].mxu0 %v2798_v15 }
 0x77a   :  { %v1411_v19 = vpop.f32.mrb[14].mxu1 }
 0x77b   :  { %v1415_v0 = vadd.f32 %v1411_v19, %v3206_v39  ;;  %v2306_v24 = vpop.f32.mrb[15].mxu1 }
 0x77d   :  { %2799 = vtanh.f32 %v1415_v0 }
 0x787   :  { %v2800_v29 = vpop.eup %2799 }
 0x788   :  { %1489 = vst [vmem:[#allocation11 + $0x70] sm:$0xff] %v2800_v29 }
 0x798   :  { %v1483_v33 = vpop.f32.mrb[30].mxu0 }
 0x799   :  { %v1487_v38 = vadd.f32 %v1483_v33, %v3174_v59  ;;  %v2341_v42 = vpop.f32.mrb[31].mxu0 }
 0x79b   :  { %2801 = vtanh.f32 %v1487_v38 }
 0x7a5   :  { %v2802_v47 = vpop.eup %2801 }
 0x7a6   :  { %1490 = vst [vmem:[#allocation11 + $0x8] sm:$0xff] %v2802_v47 }
 0x7a7   :  { %2924 = shalt.err (!%p2921_p2)
}
 0x7a8   :  { %s2925_s9 = scalar_lea.hbm %s3447_s5, 2048 }
 0x7a9   :  { %p2926_p3 = scmp.ne.s32.totalorder %s3447_s5, %s2925_s9  ;;  %p2929_p4 = scmp.lt.u32.totalorder %s2925_s9, %s3447_s5 }
 0x7ab   :  { %p2931_p5 = pnand %p2929_p4, %p2926_p3 }
 0x7ad   :  { %2934 = shalt.err (!%p2931_p5)
}
 0x7ae   :  { %1502 = dma.vmem_to_hbm [thread:$0]  %s1497_s19, 2048, %s3447_s5, [#allocation4], %s2944_s28, %s2944_s28, %s2945_s29  }
 0x7af   :  { %2941 = dma.done.wait [#allocation4], 2048  }
 0x7b0   :  { %2942 = vsyncadd [#allocation4], 4294965248 }
 0x7b1   :  { %1506 = vsyncpa [#allocation3], 1 }
 0x7b2   :  { %1507 = vsyncpa [#allocation6], 1 }
 0x7b3   :  { %1508 = vsyncpa [#allocation9], 1 }
 0x7b4   :  { %1509 = vsyncpa [#allocation4], 1 }

</bundles_post_ra>
